<compile_context>
chip_gen: v5e
topology: v5e:2x2
jax: 0.10.0
libtpu: 0.0.40
codegen_flags: <defaults>
</compile_context>

<pallas_src>
import functools

import jax
import jax.numpy as jnp
from jax import lax
from jax.experimental import pallas as pl
from jax.experimental.pallas import tpu as pltpu


def _round_up(n, m):
    return (n + m - 1) // m * m


# --------------------------------------------------------------------------- #
# Fused Pallas kernels                                                         #
# --------------------------------------------------------------------------- #
def _resblock_same_kernel(x_ref, w1_ref, b1_ref, w2_ref, b2_ref,
                          o_ref, ypad_ref, *, Wp, Wo, NV, BI):
    """dim_in == dim_out: conv3x3(s1)+BN+leaky -> conv3x3(s1)+BN -> +x -> leaky.

    x_ref    : (CP, L1)  bf16  flat zero-padded image (row-major, row stride Wp)
    w*_ref   : (CP, 9*CP) bf16 BN-scale-folded weights (tap-major, channel-minor)
    b*_ref   : (CP, 1)   f32   folded BN bias
    o_ref    : (CP, NV)  bf16  output in virtual geometry (Ho x Wp)
    ypad_ref : (CP, L2)  bf16  scratch: re-padded conv1 output, interior at BI
    """
    offs = [kh * Wp + kw for kh in range(3) for kw in range(3)]
    base2 = BI - (Wp + 1)                       # conv2 tap base inside the scratch

    # conv1: 9 contiguous bf16 tap slices stacked -> one MXU matmul (K = 9*CP).
    p1 = jnp.concatenate([x_ref[:, o:o + NV] for o in offs], axis=0)
    y1 = jnp.dot(w1_ref[...], p1, preferred_element_type=jnp.float32)
    y1 = y1 + b1_ref[...]
    y1 = jnp.where(y1 > 0, y1, 0.02 * y1)       # leaky_relu(0.02)
    # zero the garbage virtual columns (they become conv2's implicit zero padding)
    col = lax.broadcasted_iota(jnp.int32, (1, NV), 1)
    y1 = jnp.where(col % Wp < Wo, y1, 0.0)

    # Re-pad y1 for conv2. Only the small head/tail border regions need zeroing;
    # the interior [BI, BI+NV) is fully rewritten every step (128-aligned store).
    cp, L2 = ypad_ref.shape
    ypad_ref[:, :BI] = jnp.zeros((cp, BI), ypad_ref.dtype)
    ypad_ref[:, BI + NV:] = jnp.zeros((cp, L2 - BI - NV), ypad_ref.dtype)
    ypad_ref[:, BI:BI + NV] = y1.astype(ypad_ref.dtype)

    # conv2 + BN bias, identity residual, final leaky.
    p2 = jnp.concatenate([ypad_ref[:, base2 + o:base2 + o + NV] for o in offs],
                         axis=0)
    y2 = jnp.dot(w2_ref[...], p2, preferred_element_type=jnp.float32)
    y2 = y2 + b2_ref[...]
    # identity residual = interior of the padded input (bf16 copy; one extra
    # rounding in the skip path, within the test tolerance)
    y2 = y2 + x_ref[:, Wp + 1:Wp + 1 + NV].astype(jnp.float32)
    o_ref[...] = jnp.where(y2 > 0, y2, 0.02 * y2).astype(o_ref.dtype)


def _resblock_down_kernel(x_ref, w1_ref, b1_ref, w2_ref, b2_ref, ws_ref, bs_ref,
                          o_ref, ypad_ref, *, Wc, Wo, NV, BI):
    """dim_in != dim_out: conv3x3(s2)+BN+leaky -> conv3x3(s1)+BN ;
    shortcut conv1x1(s2)+BN ; add ; leaky.  Everything in COMPACT geometry
    (row stride Wc = Wo+2, NV = Ho*Wc).

    x_ref : (4, CIP, Lq) bf16 -- 2x2 (row,col)-parity phase planes of the padded
            image, each flattened with row stride Wc, so xpad[2oh+kh, 2ow+kw] is
            phase[2*(kh&1)+(kw&1)] at flat index (oh*Wc+ow) + (kh>>1)*Wc + (kw>>1).
    """
    base2 = BI - (Wc + 1)

    # conv1 (3x3, stride 2): every tap is a contiguous slice of one phase plane.
    taps = []
    for kh in range(3):
        for kw in range(3):
            s = (kh >> 1) * Wc + (kw >> 1)
            taps.append(x_ref[2 * (kh & 1) + (kw & 1), :, s:s + NV])
    p1 = jnp.concatenate(taps, axis=0)
    y1 = jnp.dot(w1_ref[...], p1, preferred_element_type=jnp.float32)
    y1 = y1 + b1_ref[...]
    y1 = jnp.where(y1 > 0, y1, 0.02 * y1)
    col = lax.broadcasted_iota(jnp.int32, (1, NV), 1)
    y1 = jnp.where(col % Wc < Wo, y1, 0.0)

    cp, L2 = ypad_ref.shape
    ypad_ref[:, :BI] = jnp.zeros((cp, BI), ypad_ref.dtype)
    ypad_ref[:, BI + NV:] = jnp.zeros((cp, L2 - BI - NV), ypad_ref.dtype)
    ypad_ref[:, BI:BI + NV] = y1.astype(ypad_ref.dtype)

    # conv2 (3x3, stride 1) on the compact re-padded conv1 output (kept in VMEM).
    offs = [kh * Wc + kw for kh in range(3) for kw in range(3)]
    p2 = jnp.concatenate([ypad_ref[:, base2 + o:base2 + o + NV] for o in offs],
                         axis=0)
    y2 = jnp.dot(w2_ref[...], p2, preferred_element_type=jnp.float32)
    y2 = y2 + b2_ref[...]

    # 1x1 stride-2 shortcut: xpad[2oh+1, 2ow+1] = phase (1,1) at flat index m.
    xs = x_ref[3, :, 0:NV]
    ys = jnp.dot(ws_ref[...], xs, preferred_element_type=jnp.float32)
    ys = ys + bs_ref[...]

    y = y2 + ys
    o_ref[...] = jnp.where(y > 0, y, 0.02 * y).astype(o_ref.dtype)


# --------------------------------------------------------------------------- #
# Wrapper-side parameter folding / layout plumbing (plain XLA, done once)      #
# --------------------------------------------------------------------------- #
_MOSAIC_PARAMS = pltpu.CompilerParams(
    dimension_semantics=("parallel",),     # batch grid -> keeps both v7x TCs busy
    # Per-step footprint here is << 1 MiB; 32 MiB scoped VMEM is safe on all gens.
    vmem_limit_bytes=32 * 1024 * 1024,
)


def _fold_w(w_hwio, scale, cin_p, cout_p):
    """BN-scale-folded conv weight, zero-padded to (cout_p, K*cin_p), bf16.
    Column layout: t*cin_p + ci with tap t = kh*3 + kw (matches the kernels)."""
    kh, kw, cin, cout = w_hwio.shape
    wf = w_hwio * scale[None, None, None, :]
    wf = jnp.pad(wf, ((0, 0), (0, 0), (0, cin_p - cin), (0, cout_p - cout)))
    wf = jnp.transpose(wf, (3, 0, 1, 2)).reshape(cout_p, kh * kw * cin_p)
    return wf.astype(jnp.bfloat16)


def _pad_bias(b, cout_p):
    return jnp.pad(b, (0, cout_p - b.shape[0])).reshape(cout_p, 1).astype(jnp.float32)


def _flat_padded_bf16(x, cin_p, length):
    """NCHW -> channel-padded, spatially zero-padded, row-major flat, bf16."""
    B, C, H, W = x.shape
    xp = jnp.pad(x, ((0, 0), (0, cin_p - C), (1, 1), (1, 1)))
    xf = xp.reshape(B, cin_p, (H + 2) * (W + 2))
    xf = jnp.pad(xf, ((0, 0), (0, 0), (0, length - (H + 2) * (W + 2))))
    return xf.astype(jnp.bfloat16)


def _phase_split_bf16(x, cin_p, Hh, Wc, Lq):
    """2x2 (row,col)-parity phase planes of the zero-padded image, each
    flattened row-major with row stride Wc: out[b, 2*pr+pc, ci, r*Wc+c] =
    xpad[b, ci, 2r+pr, 2c+pc]."""
    B, C, H, W = x.shape
    xp = jnp.pad(x, ((0, 0), (0, cin_p - C),
                     (1, 2 * Hh - H - 1), (1, 2 * Wc - W - 1)))
    xp = xp.reshape(B, cin_p, Hh, 2, Wc, 2)
    xp = jnp.transpose(xp, (0, 3, 5, 1, 2, 4))        # (B, pr, pc, C, r, c)
    xp = xp.reshape(B, 4, cin_p, Hh * Wc)
    xp = jnp.pad(xp, ((0, 0), (0, 0), (0, 0), (0, Lq - Hh * Wc)))
    return xp.astype(jnp.bfloat16)


def _resnet_block_same(params, x):
    B, C, H, W = x.shape
    CP = _round_up(C, 16)                         # bf16 sublane tile
    Hp, Wp = H + 2, W + 2
    Ho, Wo = H, W
    NV = Ho * Wp                                  # virtual output length (Ho x Wp)
    BI = _round_up(Wp + 1, 128)                   # 128-aligned interior base
    L1 = _round_up(max(NV + 2 * Wp + 2, Hp * Wp), 128)
    L2 = _round_up(BI + NV + Wp + 1, 128)

    xflat = _flat_padded_bf16(x, CP, L1)
    w1f = _fold_w(params["w1"], params["s1"], CP, CP)
    w2f = _fold_w(params["w2"], params["s2"], CP, CP)
    b1 = _pad_bias(params["b1"], CP)
    b2 = _pad_bias(params["b2"], CP)

    kernel = functools.partial(_resblock_same_kernel, Wp=Wp, Wo=Wo, NV=NV, BI=BI)
    outv = pl.pallas_call(
        kernel,
        out_shape=jax.ShapeDtypeStruct((B, CP, NV), jnp.bfloat16),
        grid=(B,),
        in_specs=[
            pl.BlockSpec((None, CP, L1), lambda b: (b, 0, 0)),
            pl.BlockSpec((CP, 9 * CP), lambda b: (0, 0)),
            pl.BlockSpec((CP, 1), lambda b: (0, 0)),
            pl.BlockSpec((CP, 9 * CP), lambda b: (0, 0)),
            pl.BlockSpec((CP, 1), lambda b: (0, 0)),
        ],
        out_specs=pl.BlockSpec((None, CP, NV), lambda b: (b, 0, 0)),
        scratch_shapes=[pltpu.VMEM((CP, L2), jnp.bfloat16)],
        compiler_params=_MOSAIC_PARAMS,
    )(xflat, w1f, b1, w2f, b2)

    # slice + upcast fuse into one XLA op (bf16 kernel writeback, f32 result).
    return outv.reshape(B, CP, Ho, Wp)[:, :C, :, :Wo].astype(jnp.float32)


def _resnet_block_down(params, x, dim_out):
    B, Cin, H, W = x.shape
    Cout = dim_out
    CIP, COP = _round_up(Cin, 16), _round_up(Cout, 16)
    Ho, Wo = (H - 1) // 2 + 1, (W - 1) // 2 + 1   # 3x3 s2 pad1 / 1x1 s2 pad0
    Hh = (H + 3) // 2                             # ceil((H+2)/2) = Ho + 1
    Wc = Wo + 2                                   # compact padded row stride
    NV = Ho * Wc
    BI = _round_up(Wc + 1, 128)
    Lq = _round_up(max(NV + Wc + 1, Hh * Wc), 128)
    L2 = _round_up(BI + NV + Wc + 1, 128)

    xph = _phase_split_bf16(x, CIP, Hh, Wc, Lq)   # (B, 4, CIP, Lq)

    w1f = _fold_w(params["w1"], params["s1"], CIP, COP)
    w2f = _fold_w(params["w2"], params["s2"], COP, COP)
    wsf = _fold_w(params["ws"], params["ss"], CIP, COP)
    b1 = _pad_bias(params["b1"], COP)
    b2 = _pad_bias(params["b2"], COP)
    bs = _pad_bias(params["bs"], COP)

    kernel = functools.partial(_resblock_down_kernel, Wc=Wc, Wo=Wo, NV=NV, BI=BI)
    outv = pl.pallas_call(
        kernel,
        out_shape=jax.ShapeDtypeStruct((B, COP, NV), jnp.bfloat16),
        grid=(B,),
        in_specs=[
            pl.BlockSpec((None, 4, CIP, Lq), lambda b: (b, 0, 0, 0)),
            pl.BlockSpec((COP, 9 * CIP), lambda b: (0, 0)),
            pl.BlockSpec((COP, 1), lambda b: (0, 0)),
            pl.BlockSpec((COP, 9 * COP), lambda b: (0, 0)),
            pl.BlockSpec((COP, 1), lambda b: (0, 0)),
            pl.BlockSpec((COP, CIP), lambda b: (0, 0)),
            pl.BlockSpec((COP, 1), lambda b: (0, 0)),
        ],
        out_specs=pl.BlockSpec((None, COP, NV), lambda b: (b, 0, 0)),
        scratch_shapes=[pltpu.VMEM((COP, L2), jnp.bfloat16)],
        compiler_params=_MOSAIC_PARAMS,
    )(xph, w1f, b1, w2f, b2, wsf, bs)

    return outv.reshape(B, COP, Ho, Wc)[:, :Cout, :, :Wo].astype(jnp.float32)


def resnet_block_forward(params, x_nchw, dim_in, dim_out):
    x = x_nchw.astype(jnp.float32)
    if dim_in == dim_out:
        return _resnet_block_same(params, x)
    return _resnet_block_down(params, x, dim_out)


# --------------------------------------------------------------------------- #
# Parameter init (xavier conv weights, random eval-mode BN stats, folded)      #
# --------------------------------------------------------------------------- #
def init_params(key, dim_in, dim_out, eps=1e-5):
    ks = jax.random.split(key, 15)

    def xavier(k, kh, kw, cin, cout):
        fan_in, fan_out = cin * kh * kw, cout * kh * kw
        bound = (6.0 / (fan_in + fan_out)) ** 0.5
        return jax.random.uniform(k, (kh, kw, cin, cout), jnp.float32,
                                  -bound, bound)

    def bn_fold(kg, kb, km, kv, c):
        gamma = jax.random.uniform(kg, (c,), jnp.float32, 0.5, 1.5)
        beta = jax.random.uniform(kb, (c,), jnp.float32, -0.5, 0.5)
        mean = jax.random.uniform(km, (c,), jnp.float32, -0.5, 0.5)
        var = jax.random.uniform(kv, (c,), jnp.float32, 0.5, 1.5)
        scale = gamma / jnp.sqrt(var + eps)
        return scale, beta - mean * scale

    p = {"w1": xavier(ks[0], 3, 3, dim_in, dim_out),
         "w2": xavier(ks[1], 3, 3, dim_out, dim_out)}
    p["s1"], p["b1"] = bn_fold(ks[2], ks[3], ks[4], ks[5], dim_out)
    p["s2"], p["b2"] = bn_fold(ks[6], ks[7], ks[8], ks[9], dim_out)
    if dim_in != dim_out:
        p["ws"] = xavier(ks[10], 1, 1, dim_in, dim_out)
        p["ss"], p["bs"] = bn_fold(ks[11], ks[12], ks[13], ks[14], dim_out)
    return p


# --------------------------------------------------------------------------- #
# Pure-JAX reference (for correctness check)                                   #
# --------------------------------------------------------------------------- #
def _conv_ref(x_nhwc, w_hwio, stride, pad):
    return lax.conv_general_dilated(
        x_nhwc, w_hwio, (stride, stride), [(pad, pad), (pad, pad)],
        dimension_numbers=("NHWC", "HWIO", "NHWC"))


def ref_forward(params, x_nchw, dim_in, dim_out):
    x = jnp.transpose(x_nchw, (0, 2, 3, 1)).astype(jnp.float32)
    bn = lambda y, s, b: y * s + b
    lrelu = lambda y: jnp.where(y > 0, y, 0.02 * y)
    if dim_in == dim_out:
        y = lrelu(bn(_conv_ref(x, params["w1"], 1, 1), params["s1"], params["b1"]))
        y = bn(_conv_ref(y, params["w2"], 1, 1), params["s2"], params["b2"]) + x
        y = lrelu(y)
    else:
        y = lrelu(bn(_conv_ref(x, params["w1"], 2, 1), params["s1"], params["b1"]))
        y = bn(_conv_ref(y, params["w2"], 1, 1), params["s2"], params["b2"])
        xs = bn(_conv_ref(x, params["ws"], 2, 0), params["ss"], params["bs"])
        y = lrelu(y + xs)
    return jnp.transpose(y, (0, 3, 1, 2))


# --------------------------------------------------------------------------- #
if __name__ == "__main__":
    key = jax.random.PRNGKey(0)
    k_same, k_down, kx = jax.random.split(key, 3)

    # NCHW input, like the PyTorch module
    x = jax.random.normal(kx, (2, 4, 16, 16), jnp.float32)

    # Branch 1: dim_in == dim_out (stride-1, identity skip)
    p_same = init_params(k_same, 4, 4)
    y_same = resnet_block_forward(p_same, x, 4, 4)

    # Branch 2: dim_in != dim_out (stride-2, 1x1 conv shortcut)
    p_down = init_params(k_down, 4, 8)
    y_down = resnet_block_forward(p_down, x, 4, 8)

    jax.block_until_ready((y_same, y_down))

    r_same = ref_forward(p_same, x, 4, 4)
    r_down = ref_forward(p_down, x, 4, 8)

    assert y_same.shape == (2, 4, 16, 16) and y_down.shape == (2, 8, 8, 8)
    # bf16 matmul operands / bf16 intermediate + output (f32 accumulation)
    # -> looser tolerance than pure f32.
    assert jnp.allclose(y_same, r_same, rtol=5e-2, atol=5e-2), \
        float(jnp.max(jnp.abs(y_same - r_same)))
    assert jnp.allclose(y_down, r_down, rtol=5e-2, atol=5e-2), \
        float(jnp.max(jnp.abs(y_down - r_down)))

    print("KERNEL_OK")
</pallas_src>

<mosaic_0001>
module attributes {stable_mosaic.version = 11 : i64} {
  func.func @_resblock_same_kernel(%arg0: i32, %arg1: memref<1x16x384xbf16, #tpu.memory_space<vmem>>, %arg2: memref<16x144xbf16, #tpu.memory_space<vmem>>, %arg3: memref<16x1xf32, #tpu.memory_space<vmem>>, %arg4: memref<16x144xbf16, #tpu.memory_space<vmem>>, %arg5: memref<16x1xf32, #tpu.memory_space<vmem>>, %arg6: memref<1x16x288xbf16, #tpu.memory_space<vmem>>, %arg7: memref<16x512xbf16, #tpu.memory_space<vmem>>) attributes {dimension_semantics = [#tpu.dimension_semantics<parallel>], iteration_bounds = array<i64: 2>, scalar_prefetch = 0 : i64, scratch_operands = 1 : i64, tpu.core_type = #tpu.core_type<tc>, window_params = [{transform_indices = @transform_0, window_bounds = array<i64: 1, 16, 384>}, {pipeline_mode = #tpu.pipeline_mode<synchronous>, transform_indices = @transform_1, window_bounds = array<i64: 16, 144>}, {pipeline_mode = #tpu.pipeline_mode<synchronous>, transform_indices = @transform_2, window_bounds = array<i64: 16, 1>}, {pipeline_mode = #tpu.pipeline_mode<synchronous>, transform_indices = @transform_3, window_bounds = array<i64: 16, 144>}, {pipeline_mode = #tpu.pipeline_mode<synchronous>, transform_indices = @transform_4, window_bounds = array<i64: 16, 1>}, {transform_indices = @transform_5, window_bounds = array<i64: 1, 16, 288>}]} {
    %c0 = arith.constant 0 : index
    %c0_0 = arith.constant 0 : index
    %c0_1 = arith.constant 0 : index
    %0 = vector.load %arg1[%c0, %c0_0, %c0_1] : memref<1x16x384xbf16, #tpu.memory_space<vmem>>, vector<1x16x288xbf16>
    %1 = vector.shape_cast %0 : vector<1x16x288xbf16> to vector<16x288xbf16>
    %c0_2 = arith.constant 0 : index
    %c0_3 = arith.constant 0 : index
    %c1 = arith.constant 1 : index
    %2 = vector.load %arg1[%c0_2, %c0_3, %c1] : memref<1x16x384xbf16, #tpu.memory_space<vmem>>, vector<1x16x288xbf16>
    %3 = vector.shape_cast %2 : vector<1x16x288xbf16> to vector<16x288xbf16>
    %c0_4 = arith.constant 0 : index
    %c0_5 = arith.constant 0 : index
    %c2 = arith.constant 2 : index
    %4 = vector.load %arg1[%c0_4, %c0_5, %c2] : memref<1x16x384xbf16, #tpu.memory_space<vmem>>, vector<1x16x288xbf16>
    %5 = vector.shape_cast %4 : vector<1x16x288xbf16> to vector<16x288xbf16>
    %c0_6 = arith.constant 0 : index
    %c0_7 = arith.constant 0 : index
    %c18 = arith.constant 18 : index
    %6 = vector.load %arg1[%c0_6, %c0_7, %c18] : memref<1x16x384xbf16, #tpu.memory_space<vmem>>, vector<1x16x288xbf16>
    %7 = vector.shape_cast %6 : vector<1x16x288xbf16> to vector<16x288xbf16>
    %c0_8 = arith.constant 0 : index
    %c0_9 = arith.constant 0 : index
    %c19 = arith.constant 19 : index
    %8 = vector.load %arg1[%c0_8, %c0_9, %c19] : memref<1x16x384xbf16, #tpu.memory_space<vmem>>, vector<1x16x288xbf16>
    %9 = vector.shape_cast %8 : vector<1x16x288xbf16> to vector<16x288xbf16>
    %c0_10 = arith.constant 0 : index
    %c0_11 = arith.constant 0 : index
    %c20 = arith.constant 20 : index
    %10 = vector.load %arg1[%c0_10, %c0_11, %c20] : memref<1x16x384xbf16, #tpu.memory_space<vmem>>, vector<1x16x288xbf16>
    %11 = vector.shape_cast %10 : vector<1x16x288xbf16> to vector<16x288xbf16>
    %c0_12 = arith.constant 0 : index
    %c0_13 = arith.constant 0 : index
    %c36 = arith.constant 36 : index
    %12 = vector.load %arg1[%c0_12, %c0_13, %c36] : memref<1x16x384xbf16, #tpu.memory_space<vmem>>, vector<1x16x288xbf16>
    %13 = vector.shape_cast %12 : vector<1x16x288xbf16> to vector<16x288xbf16>
    %c0_14 = arith.constant 0 : index
    %c0_15 = arith.constant 0 : index
    %c37 = arith.constant 37 : index
    %14 = vector.load %arg1[%c0_14, %c0_15, %c37] : memref<1x16x384xbf16, #tpu.memory_space<vmem>>, vector<1x16x288xbf16>
    %15 = vector.shape_cast %14 : vector<1x16x288xbf16> to vector<16x288xbf16>
    %c0_16 = arith.constant 0 : index
    %c0_17 = arith.constant 0 : index
    %c38 = arith.constant 38 : index
    %16 = vector.load %arg1[%c0_16, %c0_17, %c38] : memref<1x16x384xbf16, #tpu.memory_space<vmem>>, vector<1x16x288xbf16>
    %17 = vector.shape_cast %16 : vector<1x16x288xbf16> to vector<16x288xbf16>
    %18 = tpu.concatenate %1, %3, %5, %7, %9, %11, %13, %15, %17 in 0 : vector<16x288xbf16>, vector<16x288xbf16>, vector<16x288xbf16>, vector<16x288xbf16>, vector<16x288xbf16>, vector<16x288xbf16>, vector<16x288xbf16>, vector<16x288xbf16>, vector<16x288xbf16> -> vector<144x288xbf16>
    %c0_18 = arith.constant 0 : index
    %c0_19 = arith.constant 0 : index
    %19 = vector.load %arg2[%c0_18, %c0_19] : memref<16x144xbf16, #tpu.memory_space<vmem>>, vector<16x144xbf16>
    %cst = arith.constant dense<0.000000e+00> : vector<16x288xf32>
    %20 = tpu.matmul %19, %18, %cst {dimension_numbers = #tpu.dot_dimension_numbers<[1], [0], [0], [1], [0, 0, 1, 1], [], []>} : vector<16x144xbf16>, vector<144x288xbf16>, vector<16x288xf32> -> vector<16x288xf32>
    %c0_20 = arith.constant 0 : index
    %c0_21 = arith.constant 0 : index
    %21 = vector.load %arg3[%c0_20, %c0_21] : memref<16x1xf32, #tpu.memory_space<vmem>>, vector<16x1xf32>
    %22 = vector.broadcast %21 : vector<16x1xf32> to vector<16x288xf32>
    %23 = arith.addf %20, %22 : vector<16x288xf32>
    %cst_22 = arith.constant 0.000000e+00 : f32
    %24 = vector.broadcast %cst_22 : f32 to vector<16x288xf32>
    %25 = arith.cmpf ogt, %23, %24 : vector<16x288xf32>
    %cst_23 = arith.constant 2.000000e-02 : f32
    %26 = vector.broadcast %cst_23 : f32 to vector<16x288xf32>
    %27 = arith.mulf %26, %23 : vector<16x288xf32>
    %28 = arith.select %25, %23, %27 : vector<16x288xi1>, vector<16x288xf32>
    %29 = tpu.iota {dimensions = array<i32: 1>} : vector<1x288xi32>
    %c18_i32 = arith.constant 18 : i32
    %c0_i32 = arith.constant 0 : i32
    %30 = arith.cmpi eq, %c18_i32, %c0_i32 : i32
    %c1_i32 = arith.constant 1 : i32
    %31 = arith.select %30, %c1_i32, %c18_i32 : i32
    %32 = vector.broadcast %31 : i32 to vector<1x288xi32>
    %33 = arith.remsi %29, %32 : vector<1x288xi32>
    %c0_i32_24 = arith.constant 0 : i32
    %34 = vector.broadcast %c0_i32_24 : i32 to vector<1x288xi32>
    %35 = arith.cmpi ne, %33, %34 : vector<1x288xi32>
    %c0_i32_25 = arith.constant 0 : i32
    %36 = vector.broadcast %c0_i32_25 : i32 to vector<1x288xi32>
    %37 = arith.cmpi slt, %33, %36 : vector<1x288xi32>
    %c0_i32_26 = arith.constant 0 : i32
    %38 = arith.cmpi slt, %31, %c0_i32_26 : i32
    %39 = vector.broadcast %38 : i1 to vector<1x288xi1>
    %40 = vector.broadcast %39 : vector<1x288xi1> to vector<1x288xi1>
    %41 = arith.xori %37, %40 : vector<1x288xi1>
    %42 = arith.andi %41, %35 : vector<1x288xi1>
    %43 = vector.broadcast %31 : i32 to vector<1x288xi32>
    %44 = arith.addi %33, %43 : vector<1x288xi32>
    %45 = arith.select %42, %44, %33 : vector<1x288xi1>, vector<1x288xi32>
    %c16_i32 = arith.constant 16 : i32
    %46 = vector.broadcast %c16_i32 : i32 to vector<1x288xi32>
    %47 = arith.cmpi slt, %45, %46 : vector<1x288xi32>
    %cst_27 = arith.constant 0.000000e+00 : f32
    %48 = vector.shape_cast %47 : vector<1x288xi1> to vector<1x288xi1>
    %49 = vector.broadcast %48 : vector<1x288xi1> to vector<16x288xi1>
    %50 = vector.broadcast %cst_27 : f32 to vector<16x288xf32>
    %51 = arith.select %49, %28, %50 : vector<16x288xi1>, vector<16x288xf32>
    %cst_28 = arith.constant 0.000000e+00 : bf16
    %52 = vector.broadcast %cst_28 : bf16 to vector<16x128xbf16>
    %c0_29 = arith.constant 0 : index
    %c0_30 = arith.constant 0 : index
    %53 = vector.load %arg7[%c0_29, %c0_30] : memref<16x512xbf16, #tpu.memory_space<vmem>>, vector<16x128xbf16>
    tpu.vector_store %arg7[%c0_29, %c0_30], %52 {strides = array<i32>} : memref<16x512xbf16, #tpu.memory_space<vmem>>, vector<16x128xbf16>,
    %cst_31 = arith.constant 0.000000e+00 : bf16
    %54 = vector.broadcast %cst_31 : bf16 to vector<16x96xbf16>
    %c0_32 = arith.constant 0 : index
    %c416 = arith.constant 416 : index
    %55 = vector.load %arg7[%c0_32, %c416] : memref<16x512xbf16, #tpu.memory_space<vmem>>, vector<16x96xbf16>
    tpu.vector_store %arg7[%c0_32, %c416], %54 {strides = array<i32>} : memref<16x512xbf16, #tpu.memory_space<vmem>>, vector<16x96xbf16>,
    %56 = arith.truncf %51 : vector<16x288xf32> to vector<16x288xbf16>
    %c0_33 = arith.constant 0 : index
    %c128 = arith.constant 128 : index
    %57 = vector.load %arg7[%c0_33, %c128] : memref<16x512xbf16, #tpu.memory_space<vmem>>, vector<16x288xbf16>
    tpu.vector_store %arg7[%c0_33, %c128], %56 {strides = array<i32>} : memref<16x512xbf16, #tpu.memory_space<vmem>>, vector<16x288xbf16>,
    %c0_34 = arith.constant 0 : index
    %c109 = arith.constant 109 : index
    %58 = vector.load %arg7[%c0_34, %c109] : memref<16x512xbf16, #tpu.memory_space<vmem>>, vector<16x288xbf16>
    %c0_35 = arith.constant 0 : index
    %c110 = arith.constant 110 : index
    %59 = vector.load %arg7[%c0_35, %c110] : memref<16x512xbf16, #tpu.memory_space<vmem>>, vector<16x288xbf16>
    %c0_36 = arith.constant 0 : index
    %c111 = arith.constant 111 : index
    %60 = vector.load %arg7[%c0_36, %c111] : memref<16x512xbf16, #tpu.memory_space<vmem>>, vector<16x288xbf16>
    %c0_37 = arith.constant 0 : index
    %c127 = arith.constant 127 : index
    %61 = vector.load %arg7[%c0_37, %c127] : memref<16x512xbf16, #tpu.memory_space<vmem>>, vector<16x288xbf16>
    %c0_38 = arith.constant 0 : index
    %c128_39 = arith.constant 128 : index
    %62 = vector.load %arg7[%c0_38, %c128_39] : memref<16x512xbf16, #tpu.memory_space<vmem>>, vector<16x288xbf16>
    %c0_40 = arith.constant 0 : index
    %c129 = arith.constant 129 : index
    %63 = vector.load %arg7[%c0_40, %c129] : memref<16x512xbf16, #tpu.memory_space<vmem>>, vector<16x288xbf16>
    %c0_41 = arith.constant 0 : index
    %c145 = arith.constant 145 : index
    %64 = vector.load %arg7[%c0_41, %c145] : memref<16x512xbf16, #tpu.memory_space<vmem>>, vector<16x288xbf16>
    %c0_42 = arith.constant 0 : index
    %c146 = arith.constant 146 : index
    %65 = vector.load %arg7[%c0_42, %c146] : memref<16x512xbf16, #tpu.memory_space<vmem>>, vector<16x288xbf16>
    %c0_43 = arith.constant 0 : index
    %c147 = arith.constant 147 : index
    %66 = vector.load %arg7[%c0_43, %c147] : memref<16x512xbf16, #tpu.memory_space<vmem>>, vector<16x288xbf16>
    %67 = tpu.concatenate %58, %59, %60, %61, %62, %63, %64, %65, %66 in 0 : vector<16x288xbf16>, vector<16x288xbf16>, vector<16x288xbf16>, vector<16x288xbf16>, vector<16x288xbf16>, vector<16x288xbf16>, vector<16x288xbf16>, vector<16x288xbf16>, vector<16x288xbf16> -> vector<144x288xbf16>
    %c0_44 = arith.constant 0 : index
    %c0_45 = arith.constant 0 : index
    %68 = vector.load %arg4[%c0_44, %c0_45] : memref<16x144xbf16, #tpu.memory_space<vmem>>, vector<16x144xbf16>
    %cst_46 = arith.constant dense<0.000000e+00> : vector<16x288xf32>
    %69 = tpu.matmul %68, %67, %cst_46 {dimension_numbers = #tpu.dot_dimension_numbers<[1], [0], [0], [1], [0, 0, 1, 1], [], []>} : vector<16x144xbf16>, vector<144x288xbf16>, vector<16x288xf32> -> vector<16x288xf32>
    %c0_47 = arith.constant 0 : index
    %c0_48 = arith.constant 0 : index
    %70 = vector.load %arg5[%c0_47, %c0_48] : memref<16x1xf32, #tpu.memory_space<vmem>>, vector<16x1xf32>
    %71 = vector.broadcast %70 : vector<16x1xf32> to vector<16x288xf32>
    %72 = arith.addf %69, %71 : vector<16x288xf32>
    %c0_49 = arith.constant 0 : index
    %c0_50 = arith.constant 0 : index
    %c19_51 = arith.constant 19 : index
    %73 = vector.load %arg1[%c0_49, %c0_50, %c19_51] : memref<1x16x384xbf16, #tpu.memory_space<vmem>>, vector<1x16x288xbf16>
    %74 = vector.shape_cast %73 : vector<1x16x288xbf16> to vector<16x288xbf16>
    %75 = arith.extf %74 : vector<16x288xbf16> to vector<16x288xf32>
    %76 = arith.addf %72, %75 : vector<16x288xf32>
    %cst_52 = arith.constant 0.000000e+00 : f32
    %77 = vector.broadcast %cst_52 : f32 to vector<16x288xf32>
    %78 = arith.cmpf ogt, %76, %77 : vector<16x288xf32>
    %cst_53 = arith.constant 2.000000e-02 : f32
    %79 = vector.broadcast %cst_53 : f32 to vector<16x288xf32>
    %80 = arith.mulf %79, %76 : vector<16x288xf32>
    %81 = arith.select %78, %76, %80 : vector<16x288xi1>, vector<16x288xf32>
    %82 = arith.truncf %81 : vector<16x288xf32> to vector<16x288xbf16>
    %c0_54 = arith.constant 0 : index
    %c0_55 = arith.constant 0 : index
    %c0_56 = arith.constant 0 : index
    %83 = vector.load %arg6[%c0_54, %c0_55, %c0_56] : memref<1x16x288xbf16, #tpu.memory_space<vmem>>, vector<1x16x288xbf16>
    %84 = vector.shape_cast %83 : vector<1x16x288xbf16> to vector<16x288xbf16>
    %85 = vector.shape_cast %82 : vector<16x288xbf16> to vector<1x16x288xbf16>
    tpu.vector_store %arg6[%c0_54, %c0_55, %c0_56], %85 {strides = array<i32>} : memref<1x16x288xbf16, #tpu.memory_space<vmem>>, vector<1x16x288xbf16>,
    return
  }
  func.func @transform_0(%arg0: i32) -> (i32, i32, i32) {
    %c0_i32 = arith.constant 0 : i32
    %c0_i32_0 = arith.constant 0 : i32
    %c0_i32_1 = arith.constant 0 : i32
    return %arg0, %c0_i32, %c0_i32_0 : i32, i32, i32
  }
  func.func @transform_1(%arg0: i32) -> (i32, i32) {
    %c0_i32 = arith.constant 0 : i32
    %c0_i32_0 = arith.constant 0 : i32
    %c0_i32_1 = arith.constant 0 : i32
    return %c0_i32, %c0_i32_0 : i32, i32
  }
  func.func @transform_2(%arg0: i32) -> (i32, i32) {
    %c0_i32 = arith.constant 0 : i32
    %c0_i32_0 = arith.constant 0 : i32
    %c0_i32_1 = arith.constant 0 : i32
    return %c0_i32, %c0_i32_0 : i32, i32
  }
  func.func @transform_3(%arg0: i32) -> (i32, i32) {
    %c0_i32 = arith.constant 0 : i32
    %c0_i32_0 = arith.constant 0 : i32
    %c0_i32_1 = arith.constant 0 : i32
    return %c0_i32, %c0_i32_0 : i32, i32
  }
  func.func @transform_4(%arg0: i32) -> (i32, i32) {
    %c0_i32 = arith.constant 0 : i32
    %c0_i32_0 = arith.constant 0 : i32
    %c0_i32_1 = arith.constant 0 : i32
    return %c0_i32, %c0_i32_0 : i32, i32
  }
  func.func @transform_5(%arg0: i32) -> (i32, i32, i32) {
    %c0_i32 = arith.constant 0 : i32
    %c0_i32_0 = arith.constant 0 : i32
    %c0_i32_1 = arith.constant 0 : i32
    return %arg0, %c0_i32, %c0_i32_0 : i32, i32, i32
  }
}

</mosaic_0001>

<bundles_post_ra>
// kernel: tpu_custom_call.1
= control target key start
LH: loop header
LB: loop body
LE: loop exit
PB: predicated region body
PF: predicated region fallthrough
CT: control target
= control target key end

     0   :  { %10 = vsyncpa [#allocation4], 0  ;;  %s1910_s0 = inlined_call_operand.hbm [shape: bf16[2,16,384], index: 0, kind: input, shape index: {}]   ;;  %s1911_s1 = inlined_call_operand.vmem [shape: bf16[16,144], index: 1, kind: input, shape index: {}]   ;;  %s1912_s2 = inlined_call_operand.vmem [shape: f32[16,1], index: 2, kind: input, shape index: {}]   ;;  %s1913_s3 = inlined_call_operand.vmem [shape: bf16[16,144], index: 3, kind: input, shape index: {}]   ;;  %s1914_s4 = inlined_call_operand.vmem [shape: f32[16,1], index: 4, kind: input, shape index: {}]   ;;  %s1915_s5 = inlined_call_operand.hbm [shape: bf16[2,16,288], index: 5, kind: output, shape index: {}]  }
   0x1   :  { %12 = vsyncpa [#allocation4 + $0x1], 0 }
   0x2   :  { %13 = vsyncpa [#allocation5], 0 }
   0x3   :  { %15 = vsyncpa [#allocation5 + $0x1], 0  ;;  %s1440_s18 = smov 0   ;;  %s1442_s19 = smov 0  }
   0x4   :  { %s1444_s20 = smov 0   ;;  %s1446_s21 = smov 0  }
   0x5 LB: > { %s1461_s22 = sadd.s32 4294967295, %s1394_s21   ;;  %s1133_s23 = sadd.s32 4294967294, %s1394_s21   ;;  %s1394_s21 = sphi %s1446_s21, %s1936_s21   ;;  %s1390_s20 = sphi %s1444_s20, %s1935_s20   ;;  %s1386_s19 = sphi %s1442_s19, %s1934_s19   ;;  %s1382_s18 = sphi %s1440_s18, %s1933_s18  }
   0x6   : > { %s1465_s24 = sadd.s32 1, %s1394_s21   ;;  %s28_s25 = sadd.s32 1, %s1390_s20 }
   0x7   : > { %s25_s26 = ssub.s32 %s1394_s21, %s1465_s24  ;;  %p35_p0 = scmp.ne.s32.totalorder %s1390_s20, %s1386_s19 }
   0x8   : > { %p26_p1 = scmp.eq.s32.totalorder %s25_s26, 0  ;;  %p36_p2 = scmp.eq.s32.totalorder %s1394_s21, 0 }
   0x9   : > { %p41_p3 = scmp.ne.s32.totalorder %s1386_s19, %s1382_s18  ;;  %p42_p4 = scmp.eq.s32.totalorder %s1461_s22, 0 }
   0xa   : > { %s1477_s27 = scalar_select %p26_p1, %s1390_s20, %s28_s25  }
   0xb   : > { %p37_p5 = por %p36_p2, %p35_p0  ;;  %p1479_p6 = por %p42_p4, %p41_p3 }
   0xc   : > { %p149_p7 = scmp.eq.s32.totalorder %s1461_s22, 1  ;;  %p155_p8 = scmp.eq.s32.totalorder %s1133_s23, 1 }
   0xd   : > { %p1135_p9 = scmp.ge.s32.totalorder %s1394_s21, 2  ;;  %p1233_p10 = scmp.lt.s32.totalorder %s1394_s21, 2 }
   0xe   : > { %p1486_p11 = por %p149_p7, %p35_p0  ;;  %p1490_p12 = por %p155_p8, %p41_p3 }
   0xf   : > { %s187_s6 = sand.u32 1, %s1390_s20   ;;  %s1218_s7 = smul.u32 24, %s1394_s21 }
  0x10   : > { %s1217_s8 = smul.u32 24, %s187_s6  ;;  %p1499_p13 = pnand %p1233_p10, %p37_p5 }
  0x11   : > { %s196_s11 = scalar_lea.hbm %s1910_s0, %s1218_s7  ;;  %s188_s16 = scalar_lea.sflag [#allocation4], %s187_s6 }
  0x12   : > { %s197_s13 = sshll.u32 %s196_s11, 4  ;;  %s191_s14 = scalar_lea.vmem [#allocation3], %s1217_s8  ;;  %s198_s13 = int_to_ptr.hbm [resolvable:$true] %s197_s13 }
  0x13   : > { %s199_s15 = sshll.u32 %s191_s14, 4  ;;  %s1298_s17 = sshra.s32 %s198_s13, 4  ;;  %s200_s15 = int_to_ptr.vmem [resolvable:$true] %s199_s15  ;;  %s1299_s17 = int_to_ptr.hbm [resolvable:$true] %s1298_s17 }
  0x14   : > { %s1300_s23 = scalar_lea.hbm %s1299_s17, 24  ;;  %p1302_p1 = pneg %p1499_p13 }
  0x15   : > { %p1301_p0 = scmp.ne.s32.totalorder %s1299_s17, %s1300_s23  ;;  %s1305_s7 = scalar_lea.hbm %s1910_s0, 48 }
  0x16   : > { %p1306_p4 = scmp.lt.s32.totalorder %s1299_s17, %s1910_s0  ;;  %p1307_p5 = scmp.lt.s32.totalorder %s1305_s7, %s1300_s23 }
  0x17   : > { %p1303_p2 = pnand %p1302_p1, %p1301_p0 }
  0x18   : > { %p1308_p7 = por %p1307_p5, %p1306_p4 }
  0x19   : > { %p1304_p3 = pneg %p1303_p2 }
  0x1b   : > { %p1309_p8 = pnand %p1308_p7, %p1304_p3 }
  0x1d   : > { %1312 = shalt.err (!%p1309_p8)
}
  0x1e   : > { %s1396_s6 = smov 192   ;;  %s1397_s8 = smov 12  }
  0x1f   : > { %1228 = dma.hbm_to_vmem [thread:$0]  (!%p1499_p13), %s198_s13, 384, %s200_s15, %s188_s16, %s1396_s6, %s1396_s6, %s1397_s8  }
  0x20   : > { %p1137_p10 = scmp.ge.s32.totalorder %s1394_s21, 1  ;;  %p207_p0 = scmp.lt.s32.totalorder %s1394_s21, 3 }
  0x22   : > { %p208_p1 = pnand %p1137_p10, %p207_p0 }
  0x23   : > { %s1516_s11 = sand.u32 (!%p208_p1), 1, %s1386_s19  }
  0x24   : > { %211 = sbr.rel (%p208_p1) target bundleno = 882 (0x372), region = 40  ;;  %s214_s17 = scalar_lea.sflag (!%p208_p1), [#allocation4], %s1516_s11 }
  0x25   : > { %s1219_s14 = smul.u32 (!%p208_p1), 24, %s1516_s11 }
  0x27   : > { %s1522_s23 = scalar_lea.vmem (!%p208_p1), [#allocation3], %s1219_s14 }
  0x29   : > { %1373 = dma.done.wait (%p1479_p6), %s214_s17, 384  }
  0x2a   : > { %1375 = vsyncadd (%p1479_p6), %s214_s17, 4294966912  ;;  %v1140_v0 = vld [vmem:[%s1522_s23] sm:$0xf]  ;;  %v1204_v1 = vld [vmem:[%s1522_s23 + $0x8] sm:$0xf0]  ;;  %s1398_s12 = smov 91   ;;  %v491_v58 = vlaneseq }
  0x2b   : > { %v1203_v2 = vld [vmem:[%s1522_s23 + $0x4] sm:$0xf]  ;;  %v1531_v3 = vor.u32 %v1204_v1, %v1140_v0  ;;  %v1142_v4 = vld [vmem:[%s1522_s23 + $0xc] sm:$0xf0]  ;;  %s1399_s28 = smov 92   ;;  %s1400_s13 = smov 108  }
  0x2c   : > { %v1534_v5 = vor.u32 %v1203_v2, %v1142_v4  ;;  %v1148_v6 = vld [vmem:[%s1522_s23 + $0x8] sm:$0xf]  ;;  %v1205_v7 = vld [vmem:[%s1522_s23 + $0x10] sm:$0xf0]  ;;  %s1401_s15 = smov 109   ;;  %s1402_s16 = smov 110  }
  0x2d   : > { %338 = vrot.lane.b32.xlu2 %v1531_v3, %s1398_s12  ;;  %v1544_v8 = vor.u32 %v1205_v7, %v1148_v6  ;;  %s1403_s25 = smov 126   ;;  %s1404_s26 = smov 127   ;;  %vm344_vm0 = vcmask 744448   ;;  %vm332_vm1 = vcmask 752640   ;;  %vm320_vm2 = vcmask 883712   ;;  %v364_v40 = vld [vmem:[%s1912_s2] sm:$0xff] }
  0x2e   : > { %328 = vrot.lane.b32.xlu1 %v1534_v5, %s1399_s28  ;;  %340 = vrot.lane.b32.xlu0 %v1534_v5, %s1398_s12  ;;  %s1405_s7 = smov 90   ;;  %vm308_vm3 = vcmask 891904   ;;  %vm1917_vm4 = vcmask 736256   ;;  %v1206_v31 = vld [vmem:[%s1911_s1 + $0x4] sm:$0xf]  ;;  %vm296_vm5 = vcmask 900096  }
  0x2f   : > { %v1154_v32 = vld [vmem:[%s1911_s1 + $0x8] sm:$0xf0]  ;;  %vm1916_vm6 = vcmask 130048   ;;  %v1406_v41 = vmov 0   ;;  %vm284_vm7 = vcmask 1031168   ;;  %vm272_vm8 = vcmask 1039360  }
  0x30   : > { %v1157_v37 = vor.u32 %v1206_v31, %v1154_v32  ;;  %1281 = vset.pattern.permute.xlu0 %v1406_v41  ;;  %612 = vst [vmem:[#allocation2] sm:$0xf] %v1406_v41  ;;  %1282 = vset.pattern.permute.xlu1 %v1406_v41  ;;  %v365_v46 = vld [vmem:[%s1912_s2 + $0x8] sm:$0xff]  ;;  %v1152_v51 = vld [vmem:[%s1911_s1] sm:$0xf]  ;;  %v492_v59 = vand.u32 127, %v491_v58 }
  0x31   : > { %613 = vst [vmem:[#allocation2 + $0x10] sm:$0xf] %v1406_v41  ;;  %v1207_v52 = vld [vmem:[%s1911_s1 + $0x4] sm:$0xf0]  ;;  %vm614_vm15 = vcmask 1043712   ;;  %s1407_s6 = smov 19  }
  0x32   : > { %v1153_v53 = vor.u32 %v1207_v52, %v1152_v51  ;;  %v493_v60 = vadd.s32 128, %v492_v59  ;;  %v498_v61 = vand.u32 65535, %v492_v59  ;;  %v499_v63 = vshrl.u32 %v492_v59, 16  ;;  %615 = vst.msk [vmem:[#allocation2 + $0xc] sm:$0xf] %vm614_vm15, %v1406_v41  ;;  %s1348_s17 = scalar_lea.hbm %s1915_s5, 48 }
  0x33   : > { %616 = vst.msk [vmem:[#allocation2 + $0x1c] sm:$0xf] %vm614_vm15, %v1406_v41 }
  0x34   : > { %v527_v62 = vand.u32 65535, %v493_v60  ;;  %v502_v0 = vmul.u32 58254, %v498_v61  ;;  %v528_v1 = vshrl.u32 %v493_v60, 16  ;;  %v501_v4 = vmul.u32 14564, %v498_v61 }
  0x35   : > { %316 = vrot.lane.b32.xlu2 %v1534_v5, %s1400_s13 }
  0x36   : > { %330 = vrot.lane.b32.xlu1 %v1544_v8, %s1399_s28  ;;  %342 = vrot.lane.b32.xlu0 %v1544_v8, %s1398_s12  ;;  %v531_v2 = vmul.u32 58254, %v527_v62  ;;  %v505_v6 = vshll.u32 %v502_v0, 16  ;;  %v530_v7 = vmul.u32 14564, %v527_v62 }
  0x38   : > { %vm509_vm9 = vc.u32 %v501_v4, %v505_v6 }
  0x3d   : > { %304 = vrot.lane.b32.xlu2 %v1534_v5, %s1401_s15 }
  0x3e   : > { %326 = vrot.lane.b32.xlu1 %v1531_v3, %s1399_s28  ;;  %318 = vrot.lane.b32.xlu0 %v1544_v8, %s1400_s13 }
  0x45   : > { %292 = vrot.lane.b32.xlu2 %v1534_v5, %s1402_s16 }
  0x46   : > { %314 = vrot.lane.b32.xlu1 %v1531_v3, %s1400_s13  ;;  %306 = vrot.lane.b32.xlu0 %v1544_v8, %s1401_s15 }
  0x4d   : > { %280 = vrot.lane.b32.xlu2 %v1534_v5, %s1403_s25 }
  0x4e   : > { %302 = vrot.lane.b32.xlu1 %v1531_v3, %s1401_s15  ;;  %294 = vrot.lane.b32.xlu0 %v1544_v8, %s1402_s16 }
  0x55   : > { %268 = vrot.lane.b32.xlu2 %v1534_v5, %s1404_s26 }
  0x56   : > { %290 = vrot.lane.b32.xlu1 %v1531_v3, %s1402_s16  ;;  %282 = vrot.lane.b32.xlu0 %v1544_v8, %s1403_s25 }
  0x5d   : > { %352 = vrot.lane.b32.xlu2 %v1534_v5, %s1405_s7 }
  0x5e   : > { %278 = vrot.lane.b32.xlu1 %v1531_v3, %s1403_s25  ;;  %270 = vrot.lane.b32.xlu0 %v1544_v8, %s1404_s26 }
  0x65   : > { %350 = vrot.lane.b32.xlu2 %v1531_v3, %s1405_s7 }
  0x66   : > { %266 = vrot.lane.b32.xlu1 %v1531_v3, %s1404_s26  ;;  %354 = vrot.lane.b32.xlu0 %v1544_v8, %s1405_s7 }
  0x6e   : > { %368 = vperm.xlu0 %1281, %v364_v40   ;;  %373 = vperm.xlu1 %1282, %v365_v46  }
  0x87   : > { %v339_v9 = vpop.permute.xlu2 %338 }
  0x8f   : > { %v317_v10 = vpop.permute.xlu2 %316 }
  0x97   : > { %v305_v11 = vpop.permute.xlu2 %304 }
  0x9f   : > { %v293_v12 = vpop.permute.xlu2 %292 }
  0xa0   : > { %v329_v13 = vpop.permute.xlu1 %328  ;;  %v341_v14 = vpop.permute.xlu0 %340 }
  0xa1   : > { %v345_v15 = vsel %vm344_vm0, %v339_v9, %v341_v14  ;;  %v534_v9 = vshll.u32 %v531_v2, 16 }
  0xa2   : > { %389 = vmatpush.bf16.msra.mxu0 %v345_v15  ;;  %v533_v15 = vmul.u32 58254, %v528_v1 }
  0xa3   : > { %vm538_vm10 = vc.u32 %v530_v7, %v534_v9 }
  0xa7   : > { %v1589_v16 = vpop.permute.xlu2 %280 }
  0xa8   : > { %v331_v17 = vpop.permute.xlu1 %330  ;;  %v343_v18 = vpop.permute.xlu0 %342 }
  0xa9   : > { %v346_v19 = vsel %vm344_vm0, %v341_v14, %v343_v18  ;;  %v334_v20 = vsel %vm332_vm1, %v329_v13, %v331_v17  ;;  %v510_v14 = vsel %vm509_vm9, 1, %v1406_v41 }
  0xaa   : > { %417 = vmatpush.bf16.msra.mxu2 %v346_v19 }
  0xae   : > { %418 = vmatpush.bf16.msra.mxu2 %v334_v20 }
  0xaf   : > { %v1593_v21 = vpop.permute.xlu2 %268 }
  0xb0   : > { %v327_v22 = vpop.permute.xlu1 %326  ;;  %v319_v23 = vpop.permute.xlu0 %318 }
  0xb1   : > { %v322_v24 = vsel %vm320_vm2, %v317_v10, %v319_v23  ;;  %v333_v25 = vsel %vm332_vm1, %v327_v22, %v329_v13  ;;  %v540_v13 = vadd.s32 %v534_v9, %v530_v7 }
  0xb2   : > { %419 = vmatpush.bf16.msra.mxu2 %v322_v24  ;;  %390 = vmatpush.bf16.msra.mxu0 %v333_v25 }
  0xb7   : > { %v353_v26 = vpop.permute.xlu2 %352 }
  0xb8   : > { %v315_v27 = vpop.permute.xlu1 %314  ;;  %v307_v28 = vpop.permute.xlu0 %306 }
  0xb9   : > { %v321_v29 = vsel %vm320_vm2, %v315_v27, %v317_v10  ;;  %v310_v30 = vsel %vm308_vm3, %v305_v11, %v307_v28  ;;  %v511_v10 = vadd.s32 %v505_v6, %v501_v4  ;;  %v535_v27 = vshrl.u32 %v531_v2, 16 }
  0xba   : > { %391 = vmatpush.bf16.msra.mxu0 %v321_v29  ;;  %420 = vmatpush.bf16.msra.mxu2 %v310_v30 }
  0xbf   : > { %v351_v33 = vpop.permute.xlu2 %350 }
  0xc0   : > { %v303_v34 = vpop.permute.xlu1 %302  ;;  %v295_v35 = vpop.permute.xlu0 %294  ;;  %v357_v36 = vsel %vm1917_vm4, %v351_v33, %v353_v26 }
  0xc1   : > { %v309_v38 = vsel %vm308_vm3, %v303_v34, %v305_v11  ;;  %410 = vmatpush.bf16.msra.mxu1 %v357_v36  ;;  %v298_v39 = vsel %vm296_vm5, %v293_v12, %v295_v35  ;;  %v504_v11 = vmul.u32 58254, %v499_v63 }
  0xc2   : > { %392 = vmatpush.bf16.msra.mxu0 %v309_v38  ;;  %421 = vmatpush.bf16.msra.mxu2 %v298_v39 }
  0xc4   : > { %1158 = vmatmul.msk.bf16.vlgmr.msra.gmra.mxu1 %vm1916_vm6, %v1157_v37 }
  0xc5   : > { %445 = vmatpush.bf16.msrb.mxu1 %v343_v18  ;;  %v512_v18 = vadd.s32 %v510_v14, %v504_v11 }
  0xc8   : > { %v291_v42 = vpop.permute.xlu1 %290  ;;  %v283_v43 = vpop.permute.xlu0 %282 }
  0xc9   : > { %446 = vmatpush.bf16.msrb.mxu1 %v331_v17  ;;  %v297_v44 = vsel %vm296_vm5, %v291_v42, %v293_v12  ;;  %v286_v45 = vsel %vm284_vm7, %v1589_v16, %v283_v43  ;;  %v1642_v17 = vadd.s32 256, %v492_v59 }
  0xca   : > { %393 = vmatpush.bf16.msra.mxu0 %v297_v44  ;;  %422 = vmatpush.bf16.msra.mxu2 %v286_v45 }
  0xcb   : > { %v556_v20 = vand.u32 65535, %v1642_v17  ;;  %v557_v25 = vshrl.u32 %v1642_v17, 16 }
  0xcd   : > { %447 = vmatpush.bf16.msrb.mxu1 %v319_v23  ;;  %v506_v23 = vshrl.u32 %v502_v0, 16  ;;  %v559_v31 = vmul.u32 14564, %v556_v20  ;;  %v561_v32 = vmul.u32 14564, %v557_v25  ;;  %v562_v40 = vmul.u32 58254, %v557_v25 }
  0xd0   : > { %v279_v47 = vpop.permute.xlu1 %278  ;;  %v271_v48 = vpop.permute.xlu0 %270 }
  0xd1   : > { %448 = vmatpush.bf16.msrb.mxu1 %v307_v28  ;;  %v285_v49 = vsel %vm284_vm7, %v279_v47, %v1589_v16  ;;  %v274_v50 = vsel %vm272_vm8, %v1593_v21, %v271_v48  ;;  %v539_v16 = vsel %vm538_vm10, 1, %v1406_v41 }
  0xd2   : > { %394 = vmatpush.bf16.msra.mxu0 %v285_v49  ;;  %423 = vmatpush.bf16.msra.mxu2 %v274_v50 }
  0xd5   : > { %449 = vmatpush.bf16.msrb.mxu1 %v295_v35 }
  0xd6   : > { %424 = vmatpush.bf16.msra.mxu2 %v1534_v5  ;;  %v503_v5 = vmul.u32 14564, %v499_v63 }
  0xd8   : > { %v267_v54 = vpop.permute.xlu1 %266  ;;  %v355_v55 = vpop.permute.xlu0 %354  ;;  %v508_v29 = vshrl.u32 %v503_v5, 16 }
  0xd9   : > { %450 = vmatpush.bf16.msrb.mxu1 %v283_v43  ;;  %v273_v56 = vsel %vm272_vm8, %v267_v54, %v1593_v21  ;;  %v358_v57 = vsel %vm1917_vm4, %v353_v26, %v355_v55  ;;  %425 = vmatmul.bf16.vlgmr.msra.gmra.mxu2 %v1153_v53  ;;  %v541_v21 = vadd.s32 %v539_v16, %v533_v15  ;;  %v560_v26 = vmul.u32 58254, %v556_v20 }
  0xda   : > { %395 = vmatpush.bf16.msra.mxu0 %v273_v56  ;;  %438 = vmatpush.bf16.msra.mxu3 %v358_v57  ;;  %v566_v54 = vshrl.u32 %v561_v32, 16  ;;  %v1163_v56 = vld [vmem:[#allocation2] sm:$0xf]  ;;  %v1210_v57 = vld [vmem:[#allocation2 + $0xc] sm:$0xf0] }
  0xdb   : > { %v563_v33 = vshll.u32 %v560_v26, 16  ;;  %v564_v49 = vshrl.u32 %v560_v26, 16  ;;  %v1164_v58 = vor.u32 %v1210_v57, %v1163_v56 }
  0xdd   : > { %451 = vmatpush.bf16.msrb.mxu1 %v271_v48  ;;  %1159 = vmatmul.msk.bf16.vlgmr.msra.gmra.mxu3 %vm1916_vm6, %v1157_v37  ;;  %vm567_vm13 = vc.u32 %v559_v31, %v563_v33  ;;  %v569_v38 = vadd.s32 %v563_v33, %v559_v31 }
  0xde   : > { %466 = vmatpush.bf16.msrb.mxu3 %v355_v55  ;;  %396 = vmatpush.bf16.msra.mxu0 %v1531_v3  ;;  %v532_v3 = vmul.u32 14564, %v528_v1  ;;  %v568_v43 = vsel %vm567_vm13, 1, %v1406_v41 }
  0xdf   : > { %v570_v45 = vadd.s32 %v568_v43, %v562_v40  ;;  %650 = vrot.lane.b32.xlu2 %v1164_v58, %s1404_s26  ;;  %661 = vrot.lane.b32.xlu1 %v1164_v58, %s1403_s25 }
  0xe0   : > { %v536_v12 = vshll.u32 %v532_v3, 16  ;;  %v537_v34 = vshrl.u32 %v532_v3, 16  ;;  %v369_v61 = vpop.permute.xlu0 %368  ;;  %672 = vrot.lane.b32.xlu0 %v1164_v58, %s1402_s16 }
  0xe1   : > { %452 = vmatpush.bf16.msrb.mxu1 %v1544_v8  ;;  %397 = vmatmul.bf16.vlgmr.msra.gmra.mxu0 %v1153_v53  ;;  %v507_v8 = vshll.u32 %v503_v5, 16 }
  0xe2   : > { %vm542_vm12 = vc.u32 %v540_v13, %v536_v12  ;;  %v374_v12 = vpop.permute.xlu1 %373 }
  0xe3   : > { %vm513_vm11 = vc.u32 %v511_v10, %v507_v8  ;;  %v543_v22 = vsel %vm542_vm12, 1, %v1406_v41 }
  0xe4   : > { %453 = vmatmul.bf16.vlgmr.msrb.gmra.mxu1 %v1153_v53  ;;  %v514_v19 = vsel %vm513_vm11, 1, %v1406_v41  ;;  %v545_v28 = vadd.s32 %v543_v22, %v541_v21 }
  0xe5   : > { %v516_v24 = vadd.s32 %v514_v19, %v512_v18 }
  0xe6   : > { %v546_v35 = vadd.s32 %v545_v28, %v535_v27 }
  0xe7   : > { %v517_v30 = vadd.s32 %v516_v24, %v506_v23  ;;  %759 = vrot.lane.b32.xlu2 %v1164_v58, %s1407_s6 }
  0xe8   : > { %v547_v39 = vadd.s32 %v546_v35, %v537_v34 }
  0xe9   : > { %v518_v36 = vadd.s32 %v517_v30, %v508_v29 }
  0xea   : > { %v548_v44 = vshrl.u32 %v547_v39, 4 }
  0xeb   : > { %v519_v42 = vshrl.u32 %v518_v36, 4 }
  0xec   : > { %v549_v48 = vmul.u32 18, %v548_v44 }
  0xed   : > { %1160 = vmatmul.msk.bf16.vlgmr.msrb.gmra.mxu3 %vm1916_vm6, %v1157_v37  ;;  %v565_v37 = vshll.u32 %v561_v32, 16  ;;  %v520_v46 = vmul.u32 18, %v519_v42 }
  0xee   : > { %v550_v52 = vsub.s32 %v493_v60, %v549_v48 }
  0xef   : > { %vm571_vm14 = vc.u32 %v569_v38, %v565_v37  ;;  %v521_v51 = vsub.s32 %v492_v59, %v520_v46 }
  0xf0   : > { %v572_v47 = vsel %vm571_vm14, 1, %v1406_v41  ;;  %vm583_vm11 = vcmp.ne.s32.totalorder %v550_v52, 0  ;;  %vm586_vm12 = vcmp.lt.s32.totalorder %v550_v52, 0  ;;  %v592_v63 = vadd.s32 18, %v550_v52 }
  0xf1   : > { %v574_v50 = vadd.s32 %v572_v47, %v570_v45  ;;  %vm582_vm9 = vcmp.ne.s32.totalorder %v521_v51, 0  ;;  %vm585_vm10 = vcmp.lt.s32.totalorder %v521_v51, 0  ;;  %v591_v60 = vadd.s32 18, %v521_v51  ;;  %vm589_vm14 = vmand %vm586_vm12, %vm583_vm11 }
  0xf2   : > { %vm1652_vm13 = vmand %vm585_vm10, %vm582_vm9  ;;  %v595_v6 = vsel %vm589_vm14, %v592_v63, %v550_v52 }
  0xf3   : > { %v575_v55 = vadd.s32 %v574_v50, %v564_v49  ;;  %v594_v5 = vsel %vm1652_vm13, %v591_v60, %v521_v51  ;;  %vm1665_vm9 = vcmp.lt.s32.totalorder %v595_v6, 16 }
  0xf4   : > { %vm1661_vm15 = vcmp.lt.s32.totalorder %v594_v5, 16 }
  0xf5   : > { %v576_v62 = vadd.s32 %v575_v55, %v566_v54 }
  0xf7   : > { %v577_v2 = vshrl.u32 %v576_v62, 4 }
  0xf9   : > { %v578_v13 = vmul.u32 18, %v577_v2 }
  0xfb   : > { %v579_v24 = vsub.s32 %v1642_v17, %v578_v13 }
  0xfd   : > { %vm584_vm12 = vcmp.ne.s32.totalorder %v579_v24, 0  ;;  %vm587_vm13 = vcmp.lt.s32.totalorder %v579_v24, 0  ;;  %v593_v33 = vadd.s32 18, %v579_v24 }
 0x141   : > { %v412_v53 = vpop.f32.mrf.mxu1 }
 0x149   : > { %v414_v7 = vpop.f32.mrf.mxu1 }
 0x152   : > { %v673_v13 = vpop.permute.xlu0 %672 }
 0x15c   : > { %v426_v0 = vpop.f32.mrf.mxu2 }
 0x15d   : > { %v427_v41 = vadd.f32 %v426_v0, %v369_v61 }
 0x15e   : > { %v398_v1 = vpop.f32.mrf.mxu0 }
 0x15f   : > { %v399_v4 = vadd.f32 %v398_v1, %v369_v61 }
 0x160   : > { %v440_v3 = vpop.f32.mrf.mxu3 }
 0x161   : > { %v413_v9 = vadd.f32 %v412_v53, %v399_v4  ;;  %v441_v8 = vadd.f32 %v440_v3, %v427_v41  ;;  %v454_v30 = vpop.f32.mrf.mxu1 }
 0x162   : > { %v455_v35 = vadd.f32 %v454_v30, %v369_v61 }
 0x163   : > { %vm473_vm10 = vcmp.gt.f32.partialorder %v413_v9, 0.0  ;;  %v479_v14 = vmul.f32 0.02, %v413_v9  ;;  %vm474_vm11 = vcmp.gt.f32.partialorder %v441_v8, 0.0  ;;  %v480_v15 = vmul.f32 0.02, %v441_v8 }
 0x164   : > { %v428_v16 = vpop.f32.mrf.mxu2 }
 0x165   : > { %v485_v18 = vsel %vm473_vm10, %v413_v9, %v479_v14  ;;  %v486_v19 = vsel %vm474_vm11, %v441_v8, %v480_v15  ;;  %v429_v20 = vadd.f32 %v428_v16, %v374_v12  ;;  %vm590_vm11 = vmand %vm587_vm13, %vm584_vm12  ;;  %v1716_v9 = vpop.permute.xlu2 %650 }
 0x166   : > { %v606_v21 = vsel %vm1661_vm15, %v485_v18, 0.0  ;;  %v607_v22 = vsel %vm1665_vm9, %v486_v19, 0.0  ;;  %v400_v23 = vpop.f32.mrf.mxu0  ;;  %v596_v40 = vsel %vm590_vm11, %v593_v33, %v579_v24 }
 0x167   : > { %v617_v25 = vpack.c.bf16 %v607_v22, %v606_v21  ;;  %v401_v26 = vadd.f32 %v400_v23, %v374_v12  ;;  %vm599_vm4 = vcmp.lt.s32.totalorder %v596_v40, 16 }
 0x168   : > { %v442_v27 = vpop.f32.mrf.mxu3 }
 0x169   : > { %621 = vst [vmem:[#allocation2 + $0x4] sm:$0xff] %v617_v25  ;;  %v415_v28 = vadd.f32 %v414_v7, %v401_v26  ;;  %v443_v29 = vadd.f32 %v442_v27, %v429_v20  ;;  %v456_v44 = vpop.f32.mrf.mxu1 }
 0x16a   : > { %v457_v47 = vadd.f32 %v456_v44, %v374_v12  ;;  %v662_v12 = vpop.permute.xlu1 %661 }
 0x16b   : > { %vm476_vm14 = vcmp.gt.f32.partialorder %v415_v28, 0.0  ;;  %v482_v31 = vmul.f32 0.02, %v415_v28  ;;  %vm477_vm10 = vcmp.gt.f32.partialorder %v443_v29, 0.0  ;;  %v483_v32 = vmul.f32 0.02, %v443_v29 }
 0x16d   : > { %v488_v34 = vsel %vm476_vm14, %v415_v28, %v482_v31  ;;  %v489_v36 = vsel %vm477_vm10, %v443_v29, %v483_v32  ;;  %vm622_vm14 = vcmask 257024   ;;  %v1718_v8 = vpop.permute.xlu2 %759 }
 0x16e   : > { %v609_v17 = vsel %vm1661_vm15, %v488_v34, 0.0  ;;  %v610_v37 = vsel %vm1665_vm9, %v489_v36, 0.0 }
 0x16f   : > { %v619_v38 = vpack.c.bf16 %v610_v37, %v609_v17 }
 0x170   : > { %v468_v39 = vpop.f32.mrf.mxu3  ;;  %v1212_v60 = vld [vmem:[#allocation2 + $0x8] sm:$0xf]  ;;  %v1179_v41 = vld [vmem:[#allocation2 + $0x4] sm:$0xf] }
 0x171   : > { %624 = vst [vmem:[#allocation2 + $0x14] sm:$0xff] %v619_v38  ;;  %v469_v42 = vadd.f32 %v468_v39, %v455_v35  ;;  %v1171_v4 = vld [vmem:[#allocation2 + $0x8] sm:$0xf]  ;;  %v1208_v7 = vld [vmem:[#allocation2 + $0x4] sm:$0xf] }
 0x173   : > { %vm475_vm6 = vcmp.gt.f32.partialorder %v469_v42, 0.0  ;;  %v481_v43 = vmul.f32 0.02, %v469_v42 }
 0x175   : > { %v487_v45 = vsel %vm475_vm6, %v469_v42, %v481_v43 }
 0x176   : > { %v608_v46 = vsel %vm599_vm4, %v487_v45, 0.0 }
 0x177   : > { %v618_v48 = vpack.c.bf16 %v608_v46, %v608_v46 }
 0x178   : > { %v470_v49 = vpop.f32.mrf.mxu3  ;;  %v1181_v59 = vld [vmem:[#allocation2 + $0x14] sm:$0xf0]  ;;  %v1213_v0 = vld [vmem:[#allocation2 + $0x10] sm:$0xf0] }
 0x179   : > { %623 = vst.msk [vmem:[#allocation2 + $0xc] sm:$0xf] %vm622_vm14, %v618_v48  ;;  %v471_v50 = vadd.f32 %v470_v49, %v457_v47  ;;  %v1184_v63 = vor.u32 %v1212_v60, %v1181_v59  ;;  %v1180_v1 = vor.u32 %v1213_v0, %v1179_v41  ;;  %v1211_v2 = vld [vmem:[#allocation2 + $0x14] sm:$0xf0]  ;;  %v1165_v6 = vld [vmem:[#allocation2 + $0x10] sm:$0xf0] }
 0x17a   : > { %v1698_v5 = vor.u32 %v1211_v2, %v1171_v4  ;;  %v1168_v3 = vor.u32 %v1208_v7, %v1165_v6 }
 0x17b   : > { %vm478_vm15 = vcmp.gt.f32.partialorder %v471_v50, 0.0  ;;  %v484_v51 = vmul.f32 0.02, %v471_v50 }
 0x17d   : > { %v490_v52 = vsel %vm478_vm15, %v471_v50, %v484_v51 }
 0x17e   : > { %v611_v53 = vsel %vm599_vm4, %v490_v52, 0.0  ;;  %vm1930_vm4 = vcmask 130048  }
 0x17f   : > { %v620_v54 = vpack.c.bf16 %v611_v53, %v611_v53  ;;  %vm1932_vm6 = vmmov %vm1930_vm4 }
 0x180   : > { %v1187_v55 = vld [vmem:[#allocation2 + $0xc] sm:$0xf] }
 0x181   : > { %625 = vst.msk [vmem:[#allocation2 + $0x1c] sm:$0xf] %vm622_vm14, %v620_v54  ;;  %v1209_v61 = vld [vmem:[#allocation2 + $0xc] sm:$0xf] }
 0x188   : > { %v1214_v56 = vld [vmem:[#allocation2 + $0x18] sm:$0xf0] }
 0x189   : > { %v1188_v57 = vor.u32 %v1214_v56, %v1187_v55  ;;  %v1173_v58 = vld [vmem:[#allocation2 + $0x18] sm:$0xf0]  ;;  %v738_v56 = vld [vmem:[%s1914_s4] sm:$0xff] }
 0x18a   : > { %v1684_v62 = vor.u32 %v1209_v61, %v1173_v58  ;;  %v739_v61 = vld [vmem:[%s1914_s4 + $0x8] sm:$0xff] }
 0x18b   : > { %708 = vrot.lane.b32.xlu1 %v1188_v57, %s1400_s13  ;;  %716 = vrot.lane.b32.xlu0 %v1188_v57, %s1399_s28 }
 0x18c   : > { %724 = vrot.lane.b32.xlu2 %v1188_v57, %s1398_s12 }
 0x193   : > { %667 = vrot.lane.b32.xlu1 %v1684_v62, %s1403_s25  ;;  %678 = vrot.lane.b32.xlu0 %v1684_v62, %s1402_s16 }
 0x194   : > { %700 = vrot.lane.b32.xlu2 %v1188_v57, %s1401_s15 }
 0x19b   : > { %732 = vrot.lane.b32.xlu1 %v1188_v57, %s1405_s7  ;;  %714 = vrot.lane.b32.xlu0 %v1184_v63, %s1399_s28 }
 0x19c   : > { %656 = vrot.lane.b32.xlu2 %v1684_v62, %s1404_s26 }
 0x1a3   : > { %696 = vrot.lane.b32.xlu0 %v1180_v1, %s1401_s15  ;;  %722 = vrot.lane.b32.xlu1 %v1184_v63, %s1398_s12 }
 0x1a4   : > { %720 = vrot.lane.b32.xlu2 %v1180_v1, %s1398_s12 }
 0x1ab   : > { %704 = vrot.lane.b32.xlu1 %v1180_v1, %s1400_s13  ;;  %665 = vrot.lane.b32.xlu0 %v1698_v5, %s1403_s25 }
 0x1ac   : > { %712 = vrot.lane.b32.xlu2 %v1180_v1, %s1399_s28 }
 0x1b3   : > { %698 = vrot.lane.b32.xlu1 %v1184_v63, %s1401_s15  ;;  %652 = vrot.lane.b32.xlu0 %v1168_v3, %s1404_s26 }
 0x1b4   : > { %706 = vrot.lane.b32.xlu2 %v1184_v63, %s1400_s13 }
 0x1bb   : > { %730 = vrot.lane.b32.xlu0 %v1184_v63, %s1405_s7  ;;  %674 = vrot.lane.b32.xlu1 %v1168_v3, %s1402_s16 }
 0x1bc   : > { %676 = vrot.lane.b32.xlu2 %v1698_v5, %s1402_s16  ;;  %s1045_s16 = scalar_lea.sflag [#allocation5], %s1516_s11 }
 0x1c3   : > { %761 = vrot.lane.b32.xlu0 %v1168_v3, %s1407_s6  ;;  %654 = vrot.lane.b32.xlu1 %v1698_v5, %s1404_s26 }
 0x1c4   : > { %663 = vrot.lane.b32.xlu2 %v1168_v3, %s1403_s25 }
 0x1cc   : > { %728 = vrot.lane.b32.xlu2 %v1180_v1, %s1405_s7 }
 0x1e6   : > { %v725_v10 = vpop.permute.xlu2 %724 }
 0x1e7   : > { %821 = vrot.lane.b32.xlu2 %v725_v10, %s1407_s6 }
 0x1ee   : > { %v1721_v11 = vpop.permute.xlu2 %700 }
 0x1f6   : > { %v1723_v14 = vpop.permute.xlu2 %656 }
 0x1fd   : > { %v709_v15 = vpop.permute.xlu1 %708  ;;  %v717_v16 = vpop.permute.xlu0 %716 }
 0x1fe   : > { %v721_v18 = vpop.permute.xlu2 %720  ;;  %805 = vrot.lane.b32.xlu1 %v709_v15, %s1407_s6  ;;  %813 = vrot.lane.b32.xlu0 %v717_v16, %s1407_s6 }
 0x205   : > { %v668_v19 = vpop.permute.xlu1 %667  ;;  %v679_v20 = vpop.permute.xlu0 %678 }
 0x206   : > { %v713_v21 = vpop.permute.xlu2 %712  ;;  %797 = vrot.lane.b32.xlu0 %v1721_v11, %s1407_s6  ;;  %789 = vrot.lane.b32.xlu1 %v679_v20, %s1407_s6 }
 0x207   : > { %807 = vrot.lane.b32.xlu2 %v713_v21, %s1407_s6 }
 0x20d   : > { %v733_v22 = vpop.permute.xlu1 %732  ;;  %v715_v23 = vpop.permute.xlu0 %714 }
 0x20e   : > { %815 = vrot.lane.b32.xlu0 %v721_v18, %s1407_s6  ;;  %v707_v26 = vpop.permute.xlu2 %706  ;;  %v718_v28 = vsel %vm332_vm1, %v713_v21, %v715_v23  ;;  %v719_v17 = vsel %vm332_vm1, %v715_v23, %v717_v16 }
 0x20f   : > { %v711_v46 = vsel %vm320_vm2, %v707_v26, %v709_v15 }
 0x215   : > { %v723_v24 = vpop.permute.xlu1 %722  ;;  %v697_v25 = vpop.permute.xlu0 %696 }
 0x216   : > { %791 = vrot.lane.b32.xlu0 %v697_v25, %s1407_s6  ;;  %v726_v31 = vsel %vm344_vm0, %v721_v18, %v723_v24  ;;  %v727_v32 = vsel %vm344_vm0, %v723_v24, %v725_v10  ;;  %v677_v33 = vpop.permute.xlu2 %676  ;;  %vm1928_vm0 = vcmask 736256  }
 0x217   : > { %v682_v47 = vsel %vm296_vm5, %v677_v33, %v679_v20  ;;  %vm1929_vm1 = vmmov %vm1928_vm0 }
 0x21d   : > { %v705_v27 = vpop.permute.xlu1 %704  ;;  %v666_v34 = vpop.permute.xlu0 %665 }
 0x21e   : > { %799 = vrot.lane.b32.xlu1 %v705_v27, %s1407_s6  ;;  %809 = vrot.lane.b32.xlu0 %v718_v28, %s1407_s6  ;;  %v710_v29 = vsel %vm320_vm2, %v705_v27, %v707_v26  ;;  %v664_v38 = vpop.permute.xlu2 %663  ;;  %v671_v55 = vsel %vm284_vm7, %v666_v34, %v668_v19  ;;  %vm831_vm2 = vcmask 154624  }
 0x21f   : > { %801 = vrot.lane.b32.xlu2 %v710_v29, %s1407_s6  ;;  %v669_v43 = vsel %vm284_vm7, %v662_v12, %v664_v38  ;;  %v670_v45 = vsel %vm284_vm7, %v664_v38, %v666_v34  ;;  %v1193_v34 = vld [vmem:[%s1913_s3 + $0x8] sm:$0xf0] }
 0x225   : > { %v699_v30 = vpop.permute.xlu1 %698  ;;  %v653_v39 = vpop.permute.xlu0 %652 }
 0x226   : > { %817 = vrot.lane.b32.xlu1 %v726_v31, %s1407_s6  ;;  %v702_v36 = vsel %vm308_vm3, %v697_v25, %v699_v30  ;;  %v729_v49 = vpop.permute.xlu2 %728  ;;  %v658_v50 = vsel %vm272_vm8, %v1716_v9, %v653_v39  ;;  %v703_v53 = vsel %vm308_vm3, %v699_v30, %v1721_v11 }
 0x227   : > { %819 = vrot.lane.b32.xlu2 %v727_v32, %s1407_s6 }
 0x22d   : > { %v675_v35 = vpop.permute.xlu1 %674  ;;  %v731_v48 = vpop.permute.xlu0 %730 }
 0x22e   : > { %793 = vrot.lane.b32.xlu1 %v702_v36, %s1407_s6  ;;  %v680_v37 = vsel %vm296_vm5, %v673_v13, %v675_v35  ;;  %v681_v42 = vsel %vm296_vm5, %v675_v35, %v677_v33  ;;  %v735_v51 = vsel %vm1928_vm0, %v731_v48, %v733_v22  ;;  %v734_v52 = vsel %vm1929_vm1, %v729_v49, %v731_v48  ;;  %v1215_v33 = vld [vmem:[%s1913_s3 + $0x4] sm:$0xf]  ;;  %vm1931_vm5 = vmmov %vm1930_vm4 }
 0x22f   : > { %811 = vrot.lane.b32.xlu2 %v719_v17, %s1407_s6  ;;  %783 = vrot.lane.b32.xlu0 %v680_v37, %s1407_s6  ;;  %v975_v48 = vld [vmem:[%s1522_s23 + $0xc] sm:$0xff] }
 0x235   : > { %v655_v40 = vpop.permute.xlu1 %654  ;;  %v1787_v57 = vpop.permute.xlu0 %761 }
 0x236   : > { %785 = vrot.lane.b32.xlu1 %v681_v42, %s1407_s6  ;;  %v659_v44 = vsel %vm272_vm8, %v653_v39, %v655_v40  ;;  %v660_v54 = vsel %vm272_vm8, %v655_v40, %v1723_v14  ;;  %v1191_v40 = vld [vmem:[%s1913_s3] sm:$0xf]  ;;  %v1216_v42 = vld [vmem:[%s1913_s3 + $0x4] sm:$0xf0] }
 0x237   : > { %775 = vrot.lane.b32.xlu0 %v669_v43, %s1407_s6  ;;  %769 = vrot.lane.b32.xlu2 %v659_v44, %s1407_s6  ;;  %v1196_v43 = vor.u32 %v1215_v33, %v1193_v34  ;;  %v832_v44 = vsel %vm831_vm2, %v1718_v8, %v1787_v57  ;;  %v981_v8 = vunpack.c.h.bf16 %v975_v48 }
 0x23e   : > { %777 = vrot.lane.b32.xlu1 %v670_v45, %s1407_s6  ;;  %v1192_v45 = vor.u32 %v1216_v42, %v1191_v40 }
 0x23f   : > { %803 = vrot.lane.b32.xlu0 %v711_v46, %s1407_s6  ;;  %787 = vrot.lane.b32.xlu2 %v682_v47, %s1407_s6  ;;  %v974_v47 = vld [vmem:[%s1522_s23 + $0x8] sm:$0xf] }
 0x241   : > { %v822_v58 = vpop.permute.xlu2 %821 }
 0x246   : > { %767 = vrot.lane.b32.xlu1 %v658_v50, %s1407_s6 }
 0x247   : > { %827 = vrot.lane.b32.xlu0 %v735_v51, %s1407_s6  ;;  %825 = vrot.lane.b32.xlu2 %v734_v52, %s1407_s6 }
 0x24e   : > { %795 = vrot.lane.b32.xlu1 %v703_v53, %s1407_s6  ;;  %v979_v53 = vunpack.c.l.bf16 %v974_v47 }
 0x24f   : > { %781 = vrot.lane.b32.xlu0 %v668_v19, %s1407_s6  ;;  %771 = vrot.lane.b32.xlu2 %v660_v54, %s1407_s6  ;;  %v980_v54 = vunpack.c.l.bf16 %v975_v48 }
 0x256   : > { %779 = vrot.lane.b32.xlu1 %v671_v55, %s1407_s6  ;;  %v973_v55 = vld [vmem:[%s1522_s23] sm:$0xff] }
 0x257   : > { %823 = vrot.lane.b32.xlu0 %v729_v49, %s1407_s6  ;;  %773 = vrot.lane.b32.xlu2 %v1723_v14, %s1407_s6  ;;  %v976_v49 = vld [vmem:[%s1522_s23 + $0x14] sm:$0xf]  ;;  %s1220_s23 = smul.u32 24, %s1461_s22 }
 0x259   : > { %s1056_s13 = scalar_lea.hbm %s1915_s5, %s1220_s23 }
 0x25e   : > { %763 = vrot.lane.b32.xlu1 %v1698_v5, %s1407_s6 }
 0x25f   : > { %742 = vperm.xlu0 %1281, %v738_v56   ;;  %829 = vrot.lane.b32.xlu2 %v733_v22, %s1407_s6  ;;  %v982_v56 = vunpack.c.l.bf16 %v976_v49 }
 0x261   : > { %v808_v59 = vpop.permute.xlu2 %807 }
 0x266   : > { %765 = vrot.lane.b32.xlu1 %v1684_v62, %s1407_s6 }
 0x26e   : > { %747 = vperm.xlu1 %1282, %v739_v61   ;;  %v978_v61 = vunpack.c.h.bf16 %v973_v55 }
 0x270   : > { %v814_v60 = vpop.permute.xlu0 %813  ;;  %v806_v41 = vpop.permute.xlu1 %805 }
 0x278   : > { %v1792_v0 = vpop.permute.xlu0 %797  ;;  %v1795_v4 = vpop.permute.xlu1 %789 }
 0x279   : > { %v802_v63 = vpop.permute.xlu2 %801 }
 0x280   : > { %v816_v62 = vpop.permute.xlu0 %815 }
 0x281   : > { %v820_v1 = vpop.permute.xlu2 %819 }
 0x282   : > { %v855_v2 = vsel %vm831_vm2, %v820_v1, %v822_v58  ;;  %v977_v58 = vunpack.c.l.bf16 %v973_v55 }
 0x283   : > { %945 = vmatpush.bf16.msrb.mxu0 %v855_v2 }
 0x288   : > { %v792_v7 = vpop.permute.xlu0 %791 }
 0x289   : > { %v812_v5 = vpop.permute.xlu2 %811 }
 0x28a   : > { %v852_v6 = vsel %vm831_vm2, %v812_v5, %v814_v60  ;;  %v1293_v60 = vpack.i.bf16 %v982_v56, %v981_v8 }
 0x28b   : > { %946 = vmatpush.bf16.msrb.mxu0 %v852_v6 }
 0x28c   : > { %1294 = vrot.lane.b32.xlu1 %v1293_v60, %s1401_s15 }
 0x290   : > { %v800_v3 = vpop.permute.xlu1 %799  ;;  %v810_v11 = vpop.permute.xlu0 %809 }
 0x291   : > { %v1798_v9 = vpop.permute.xlu2 %769  ;;  %v850_v15 = vsel %vm831_vm2, %v808_v59, %v810_v11  ;;  %v851_v16 = vsel %vm831_vm2, %v810_v11, %v812_v5  ;;  %v847_v21 = vsel %vm831_vm2, %v800_v3, %v802_v63  ;;  %v1288_v59 = vpack.i.bf16 %v980_v54, %v979_v53 }
 0x293   : > { %1289 = vrot.lane.b32.xlu0 %v1288_v59, %s1401_s15 }
 0x298   : > { %v818_v10 = vpop.permute.xlu1 %817 }
 0x299   : > { %v853_v12 = vsel %vm831_vm2, %v816_v62, %v818_v10  ;;  %v1801_v13 = vpop.permute.xlu2 %787  ;;  %v854_v14 = vsel %vm831_vm2, %v818_v10, %v820_v1 }
 0x29a   : > { %889 = vmatpush.bf16.msra.mxu3 %v853_v12  ;;  %917 = vmatpush.bf16.msrb.mxu2 %v854_v14  ;;  %v843_v1 = vsel %vm831_vm2, %v1801_v13, %v1795_v4 }
 0x29e   : > { %890 = vmatpush.bf16.msra.mxu3 %v850_v15  ;;  %918 = vmatpush.bf16.msrb.mxu2 %v851_v16 }
 0x2a0   : > { %v794_v18 = vpop.permute.xlu1 %793 }
 0x2a1   : > { %v1806_v19 = vpop.permute.xlu2 %825  ;;  %v784_v20 = vpop.permute.xlu0 %783  ;;  %v844_v22 = vsel %vm831_vm2, %v792_v7, %v794_v18 }
 0x2a2   : > { %891 = vmatpush.bf16.msra.mxu3 %v847_v21 }
 0x2a6   : > { %892 = vmatpush.bf16.msra.mxu3 %v844_v22 }
 0x2a8   : > { %v786_v23 = vpop.permute.xlu1 %785 }
 0x2a9   : > { %v1810_v24 = vpop.permute.xlu2 %771  ;;  %v776_v25 = vpop.permute.xlu0 %775  ;;  %v841_v26 = vsel %vm831_vm2, %v784_v20, %v786_v23 }
 0x2aa   : > { %893 = vmatpush.bf16.msra.mxu3 %v841_v26  ;;  %v836_v4 = vsel %vm831_vm2, %v1798_v9, %v1810_v24 }
 0x2b0   : > { %v778_v27 = vpop.permute.xlu1 %777 }
 0x2b1   : > { %v1813_v28 = vpop.permute.xlu2 %773  ;;  %v804_v29 = vpop.permute.xlu0 %803  ;;  %v838_v30 = vsel %vm831_vm2, %v776_v25, %v778_v27 }
 0x2b2   : > { %894 = vmatpush.bf16.msra.mxu3 %v838_v30  ;;  %v848_v31 = vsel %vm831_vm2, %v802_v63, %v804_v29  ;;  %v849_v32 = vsel %vm831_vm2, %v804_v29, %v806_v41  ;;  %v1283_v63 = vpack.i.bf16 %v978_v61, %v977_v58  ;;  %v842_v41 = vsel %vm831_vm2, %v786_v23, %v1801_v13 }
 0x2b3   : > { %919 = vmatpush.bf16.msrb.mxu2 %v848_v31  ;;  %947 = vmatpush.bf16.msrb.mxu0 %v849_v32  ;;  %v837_v7 = vsel %vm831_vm2, %v1810_v24, %v1813_v28 }
 0x2b4   : > { %1284 = vrot.lane.b32.xlu2 %v1283_v63, %s1401_s15  ;;  %s244_s15 = scalar_lea.vmem [#allocation6], %s1219_s14  ;;  %s1059_s14 = sshll.u32 %s1056_s13, 4  ;;  %s1060_s14 = int_to_ptr.hbm [resolvable:$true] %s1059_s14 }
 0x2b5   : > { %s1057_s22 = sshll.u32 %s244_s15, 4  ;;  %s1342_s25 = sshra.s32 %s1060_s14, 4  ;;  %s1058_s22 = int_to_ptr.vmem [resolvable:$true] %s1057_s22  ;;  %s1343_s25 = int_to_ptr.hbm [resolvable:$true] %s1342_s25 }
 0x2b6   : > { %s1344_s26 = scalar_lea.hbm %s1343_s25, 24  ;;  %p1349_p3 = scmp.lt.s32.totalorder %s1343_s25, %s1915_s5 }
 0x2b7   : > { %p1345_p6 = scmp.ne.s32.totalorder %s1343_s25, %s1344_s26  ;;  %p1350_p4 = scmp.lt.s32.totalorder %s1348_s17, %s1344_s26 }
 0x2b8   : > { %v768_v35 = vpop.permute.xlu1 %767 }
 0x2b9   : > { %v830_v36 = vpop.permute.xlu2 %829  ;;  %v828_v17 = vpop.permute.xlu0 %827  ;;  %v835_v37 = vsel %vm831_vm2, %v768_v35, %v1798_v9  ;;  %p1346_p13 = pnand %p1345_p6, %p1486_p11  ;;  %p1351_p5 = por %p1350_p4, %p1349_p3 }
 0x2ba   : > { %v857_v38 = vsel %vm831_vm2, %v1806_v19, %v828_v17  ;;  %v858_v39 = vsel %vm831_vm2, %v828_v17, %v830_v36  ;;  %895 = vmatpush.bf16.msra.mxu3 %v835_v37 }
 0x2bb   : > { %938 = vmatpush.bf16.msra.mxu1 %v857_v38  ;;  %p1347_p2 = pneg %p1346_p13 }
 0x2bd   : > { %p1352_p7 = pnand %p1351_p5, %p1347_p2 }
 0x2be   : > { %896 = vmatpush.bf16.msra.mxu3 %v832_v44  ;;  %1198 = vmatmul.msk.bf16.vlgmr.msra.gmra.mxu1 %vm1930_vm4, %v1196_v43 }
 0x2bf   : > { %966 = vmatpush.bf16.msrb.mxu1 %v858_v39 }
 0x2c0   : > { %v796_v46 = vpop.permute.xlu1 %795 }
 0x2c1   : > { %897 = vmatmul.bf16.vlgmr.msra.gmra.mxu3 %v1192_v45  ;;  %v782_v50 = vpop.permute.xlu0 %781  ;;  %v845_v51 = vsel %vm831_vm2, %v794_v18, %v796_v46  ;;  %v846_v52 = vsel %vm831_vm2, %v796_v46, %v1792_v0 }
 0x2c2   : > { %920 = vmatpush.bf16.msrb.mxu2 %v845_v51  ;;  %948 = vmatpush.bf16.msrb.mxu0 %v846_v52 }
 0x2c6   : > { %921 = vmatpush.bf16.msrb.mxu2 %v842_v41  ;;  %949 = vmatpush.bf16.msrb.mxu0 %v843_v1 }
 0x2c8   : > { %v780_v0 = vpop.permute.xlu1 %779 }
 0x2c9   : > { %v824_v2 = vpop.permute.xlu0 %823  ;;  %v839_v62 = vsel %vm831_vm2, %v778_v27, %v780_v0  ;;  %v840_v5 = vsel %vm831_vm2, %v780_v0, %v782_v50 }
 0x2ca   : > { %v856_v6 = vsel %vm831_vm2, %v824_v2, %v1806_v19  ;;  %922 = vmatpush.bf16.msrb.mxu2 %v839_v62  ;;  %950 = vmatpush.bf16.msrb.mxu0 %v840_v5 }
 0x2cb   : > { %910 = vmatpush.bf16.msrb.mxu3 %v856_v6 }
 0x2ce   : > { %923 = vmatpush.bf16.msrb.mxu2 %v836_v4  ;;  %951 = vmatpush.bf16.msrb.mxu0 %v837_v7 }
 0x2cf   : > { %1199 = vmatmul.msk.bf16.vlgmr.msrb.gmra.mxu1 %vm1931_vm5, %v1196_v43 }
 0x2d0   : > { %v764_v3 = vpop.permute.xlu1 %763 }
 0x2d1   : > { %1197 = vmatmul.msk.bf16.vlgmr.msrb.gmra.mxu3 %vm1932_vm6, %v1196_v43  ;;  %v833_v10 = vsel %vm831_vm2, %v1787_v57, %v764_v3  ;;  %v743_v14 = vpop.permute.xlu0 %742 }
 0x2d2   : > { %924 = vmatpush.bf16.msrb.mxu2 %v833_v10 }
 0x2d5   : > { %925 = vmatmul.bf16.vlgmr.msrb.gmra.mxu2 %v1192_v45 }
 0x2d8   : > { %v766_v11 = vpop.permute.xlu1 %765 }
 0x2d9   : > { %v834_v12 = vsel %vm831_vm2, %v764_v3, %v766_v11 }
 0x2da   : > { %952 = vmatpush.bf16.msrb.mxu0 %v834_v12 }
 0x2dd   : > { %953 = vmatmul.bf16.vlgmr.msrb.gmra.mxu0 %v1192_v45 }
 0x2e0   : > { %v748_v16 = vpop.permute.xlu1 %747 }
 0x2fe   : > { %v1295_v27 = vpop.permute.xlu1 %1294 }
 0x2ff   : > { %v1296_v35 = vunpack.i.l.bf16 %v1295_v27  ;;  %v1297_v47 = vunpack.i.h.bf16 %v1295_v27 }
 0x301   : > { %v1005_v56 = vsel %vm308_vm3, %v1296_v35, %v1297_v47 }
 0x305   : > { %v1290_v23 = vpop.permute.xlu0 %1289 }
 0x306   : > { %v1291_v26 = vunpack.i.l.bf16 %v1290_v23  ;;  %v1292_v32 = vunpack.i.h.bf16 %v1290_v23 }
 0x308   : > { %v1004_v44 = vsel %vm308_vm3, %v1292_v32, %v1296_v35 }
 0x30e   : > { %v1285_v18 = vpop.permute.xlu2 %1284 }
 0x30f   : > { %v1287_v20 = vunpack.i.h.bf16 %v1285_v18  ;;  %v1286_v21 = vunpack.i.l.bf16 %v1285_v18 }
 0x311   : > { %v1002_v25 = vsel %vm308_vm3, %v1286_v21, %v1287_v20  ;;  %v1003_v33 = vsel %vm308_vm3, %v1287_v20, %v1291_v26 }
 0x33b   : > { %v940_v13 = vpop.f32.mrf.mxu1 }
 0x343   : > { %v942_v19 = vpop.f32.mrf.mxu1 }
 0x344   : > { %v898_v9 = vpop.f32.mrf.mxu3 }
 0x345   : > { %v899_v22 = vadd.f32 %v898_v9, %v743_v14 }
 0x34c   : > { %v900_v15 = vpop.f32.mrf.mxu3  ;;  %v968_v31 = vpop.f32.mrf.mxu1 }
 0x34d   : > { %v901_v37 = vadd.f32 %v900_v15, %v748_v16 }
 0x354   : > { %v912_v24 = vpop.f32.mrf.mxu3  ;;  %v970_v59 = vpop.f32.mrf.mxu1 }
 0x355   : > { %v913_v57 = vadd.f32 %v912_v24, %v899_v22 }
 0x357   : > { %v1012_v29 = vadd.f32 %v1002_v25, %v913_v57 }
 0x358   : > { %v926_v28 = vpop.f32.mrf.mxu2 }
 0x359   : > { %v927_v30 = vadd.f32 %v926_v28, %v743_v14  ;;  %v1024_v39 = vmul.f32 0.02, %v1012_v29  ;;  %vm1018_vm7 = vcmp.gt.f32.partialorder %v1012_v29, 0.0 }
 0x35a   : > { %v954_v34 = vpop.f32.mrf.mxu0 }
 0x35b   : > { %v941_v36 = vadd.f32 %v940_v13, %v927_v30  ;;  %v955_v17 = vadd.f32 %v954_v34, %v743_v14  ;;  %v1030_v49 = vsel %vm1018_vm7, %v1012_v29, %v1024_v39 }
 0x35c   : > { %v914_v38 = vpop.f32.mrf.mxu3 }
 0x35d   : > { %v1013_v40 = vadd.f32 %v1003_v33, %v941_v36  ;;  %v969_v42 = vadd.f32 %v968_v31, %v955_v17  ;;  %v915_v43 = vadd.f32 %v914_v38, %v901_v37 }
 0x35f   : > { %vm1019_vm8 = vcmp.gt.f32.partialorder %v1013_v40, 0.0  ;;  %v1025_v45 = vmul.f32 0.02, %v1013_v40  ;;  %v1014_v46 = vadd.f32 %v1291_v26, %v969_v42  ;;  %v1015_v53 = vadd.f32 %v1004_v44, %v915_v43 }
 0x360   : > { %v928_v48 = vpop.f32.mrf.mxu2 }
 0x361   : > { %v1031_v50 = vsel %vm1019_vm8, %v1013_v40, %v1025_v45  ;;  %vm1020_vm9 = vcmp.gt.f32.partialorder %v1014_v46, 0.0  ;;  %v1026_v51 = vmul.f32 0.02, %v1014_v46  ;;  %v929_v54 = vadd.f32 %v928_v48, %v748_v16 }
 0x362   : > { %v1036_v52 = vpack.c.bf16 %v1031_v50, %v1030_v49  ;;  %v956_v55 = vpop.f32.mrf.mxu0  ;;  %v1027_v41 = vmul.f32 0.02, %v1015_v53  ;;  %vm1021_vm12 = vcmp.gt.f32.partialorder %v1015_v53, 0.0 }
 0x363   : > { %v1032_v8 = vsel %vm1020_vm9, %v1014_v46, %v1026_v51  ;;  %v957_v58 = vadd.f32 %v956_v55, %v748_v16  ;;  %v943_v60 = vadd.f32 %v942_v19, %v929_v54 }
 0x364   : > { %1040 = vst [vmem:[%s244_s15] sm:$0xff] %v1036_v52  ;;  %v1037_v61 = vpack.c.bf16 %v1032_v8, %v1032_v8  ;;  %v1033_v5 = vsel %vm1021_vm12, %v1015_v53, %v1027_v41 }
 0x365   : > { %v971_v63 = vadd.f32 %v970_v59, %v957_v58  ;;  %v1016_v1 = vadd.f32 %v1005_v56, %v943_v60 }
 0x366   : > { %1041 = vst.msk [vmem:[%s244_s15 + $0x8] sm:$0xf] %vm622_vm14, %v1037_v61 }
 0x367   : > { %v1017_v0 = vadd.f32 %v1297_v47, %v971_v63  ;;  %vm1022_vm3 = vcmp.gt.f32.partialorder %v1016_v1, 0.0  ;;  %v1028_v2 = vmul.f32 0.02, %v1016_v1 }
 0x369   : > { %vm1023_vm13 = vcmp.gt.f32.partialorder %v1017_v0, 0.0  ;;  %v1029_v62 = vmul.f32 0.02, %v1017_v0  ;;  %v1034_v6 = vsel %vm1022_vm3, %v1016_v1, %v1028_v2 }
 0x36a   : > { %v1038_v4 = vpack.c.bf16 %v1034_v6, %v1033_v5 }
 0x36b   : > { %v1035_v7 = vsel %vm1023_vm13, %v1017_v0, %v1029_v62 }
 0x36c   : > { %v1039_v3 = vpack.c.bf16 %v1035_v7, %v1035_v7  ;;  %1042 = vst [vmem:[%s244_s15 + $0xc] sm:$0xff] %v1038_v4 }
 0x36e   : > { %1043 = vst.msk [vmem:[%s244_s15 + $0x14] sm:$0xf] %vm622_vm14, %v1039_v3 }
 0x36f   : > { %1355 = shalt.err (!%p1352_p7)
}
 0x370   : > { %s1408_s11 = smov 192   ;;  %s1409_s6 = smov 12  }
 0x371   : > { %1223 = dma.vmem_to_hbm [thread:$0]  (%p1486_p11), %s1058_s22, 384, %s1060_s14, %s1045_s16, %s1408_s11, %s1408_s11, %s1409_s6  }
 0x372 PF: > { %s1074_s23 = sand.u32 1, %s1382_s18   ;;  %p1230_p8 = pnand %p1135_p9, %p1490_p12 }
 0x373   : > { %s1075_s15 = scalar_lea.sflag [#allocation5], %s1074_s23 }
 0x374   : > { %p1231_p10 = pneg %p1230_p8 }
 0x376   : > { %1377 = dma.done.wait (%p1231_p10), %s1075_s15, 384  }
 0x377   : > { %1379 = vsyncadd (%p1231_p10), %s1075_s15, 4294966912  ;;  %p18_p0 = scmp.ge.s32.totalorder %s1465_s24, 4   ;;  %s1933_s18 = smov %s1386_s19 }
 0x378   : > { %s1934_s19 = smov %s1390_s20  ;;  %s1935_s20 = smov %s1477_s27 }
 0x379   : > { %s1936_s21 = smov %s1465_s24  ;;  %20 = sbr.rel (!%p18_p0) target bundleno = 5 (0x5), region = 85 }
 0x37e   :  { %1081 = vsyncpa [#allocation4], 1 }
 0x37f   :  { %1083 = vsyncpa [#allocation4 + $0x1], 1 }
 0x380   :  { %1084 = vsyncpa [#allocation5], 1 }
 0x381   :  { %1086 = vsyncpa [#allocation5 + $0x1], 1 }

</bundles_post_ra>
